<compile_context>
chip_gen: v7x
topology: tpu7x:2x2x1
jax: 0.10.0
libtpu: 0.0.40
codegen_flags: <defaults>
</compile_context>

<pallas_src>
import math
import functools

import jax
import jax.numpy as jnp
from jax import lax
from jax.experimental import pallas as pl
from jax.experimental.pallas import tpu as pltpu


def _round_up(v, m):
    return (v + m - 1) // m * m


def _gelu_exact(x):
    # PyTorch nn.GELU(approximate='none'): 0.5*x*(1+erf(x/sqrt(2))).
    return 0.5 * x * (1.0 + lax.erf(x * (1.0 / math.sqrt(2.0))))


def attention_block_kernel(x_ref,
                           n1_g_ref, n1_b_ref,
                           q_w_ref, k_w_ref, v_w_ref,      # (H, hd, Dp) bf16
                           proj_w_ref, proj_b_ref,         # (Dp, Dp) bf16 / (1, Dp) f32
                           n2_g_ref, n2_b_ref,
                           fc1_w_ref, fc1_b_ref,           # (Dp, Hp) bf16 / (1, Hp) f32
                           fc2_w_ref, fc2_b_ref,           # (Hp, Dp) bf16 / (1, Dp) f32
                           o_ref,                          # (R, Dp) f32
                           ctx_ref,                        # (R, Dp) bf16 scratch (head ctx slab)
                           q_s_ref, k_s_ref, v_s_ref,      # (R, hd) bf16 scratch (current head)
                           *, num_heads, batch_tile, seq_len, true_dim):
    H = num_heads
    Bt = batch_tile
    N = seq_len
    D = true_dim
    R, Dp = x_ref.shape
    hd = D // H
    row_align = N & (-N)                                   # largest pow2 divisor of N
    contract_last = (((1,), (1,)), ((), ()))               # contract both last dims

    def layernorm(z, g, b):
        # Stats over the true D lanes; padded lanes of z are zero by construction.
        mu = jnp.sum(z, axis=-1, keepdims=True) * (1.0 / D)
        diff = z - mu
        if Dp != D:
            lane = lax.broadcasted_iota(jnp.int32, (1, Dp), 1)
            diff = jnp.where(lane < D, diff, 0.0)
        var = jnp.sum(diff * diff, axis=-1, keepdims=True) * (1.0 / D)
        # gamma/beta are zero in padded lanes -> output padded lanes stay 0.
        return diff * lax.rsqrt(var + 1e-5) * g + b

    x = x_ref[...].astype(jnp.float32)                     # (R, Dp)

    # ------------------------- attention branch -------------------------
    xn = layernorm(x, n1_g_ref[...], n1_b_ref[...])
    xnb = xn.astype(jnp.bfloat16)

    if Dp != D:
        # Padded ctx columns meet zero proj-weight rows; keep them finite (zero).
        ctx_ref[...] = jnp.zeros_like(ctx_ref)

    # Static head loop (H is small); per-head projection keeps the MXU contraction
    # D-deep and the head column offsets static.
    for h in range(H):
        c0 = h * hd
        q_s_ref[...] = lax.dot_general(xnb, q_w_ref[h], contract_last,
                                       preferred_element_type=jnp.float32
                                       ).astype(jnp.bfloat16)        # scale pre-folded
        k_s_ref[...] = lax.dot_general(xnb, k_w_ref[h], contract_last,
                                       preferred_element_type=jnp.float32
                                       ).astype(jnp.bfloat16)
        v_s_ref[...] = lax.dot_general(xnb, v_w_ref[h], contract_last,
                                       preferred_element_type=jnp.float32
                                       ).astype(jnp.bfloat16)

        # TODO(synk): flash-style query tiling for large N; this materializes one
        #             (N, N) f32 score matrix per (head, batch) step.
        @pl.loop(0, Bt)
        def _per_batch(b):
            r0 = b * N
            if row_align > 1:
                r0 = pl.multiple_of(r0, row_align)
            qb = q_s_ref[pl.ds(r0, N), :]
            kb = k_s_ref[pl.ds(r0, N), :]
            vb = v_s_ref[pl.ds(r0, N), :]
            s = lax.dot_general(qb, kb, contract_last,
                                preferred_element_type=jnp.float32)   # (N, N)
            s = s - jnp.max(s, axis=-1, keepdims=True)
            e = jnp.exp(s)
            a = e * pl.reciprocal(jnp.sum(e, axis=-1, keepdims=True), approx=True)
            ctx = jnp.dot(a.astype(jnp.bfloat16), vb,
                          preferred_element_type=jnp.float32)         # (N, hd)
            ctx_ref[pl.ds(r0, N), pl.ds(c0, hd)] = ctx.astype(jnp.bfloat16)

    # Single full-depth proj matmul over the whole lane-dense (R, Dp) slab.
    x1 = x + jnp.dot(ctx_ref[...], proj_w_ref[...],
                     preferred_element_type=jnp.float32) + proj_b_ref[...]

    # ---------------------------- MLP branch ----------------------------
    xn2 = layernorm(x1, n2_g_ref[...], n2_b_ref[...])
    h1 = jnp.dot(xn2.astype(jnp.bfloat16), fc1_w_ref[...],
                 preferred_element_type=jnp.float32) + fc1_b_ref[...]
    h1 = _gelu_exact(h1)
    mlp = jnp.dot(h1.astype(jnp.bfloat16), fc2_w_ref[...],
                  preferred_element_type=jnp.float32) + fc2_b_ref[...]

    o_ref[...] = (x1 + mlp).astype(o_ref.dtype)            # residual 2


def _vmem_capacity_bytes():
    try:
        info = pltpu.get_tpu_info()
        cap = getattr(info, "vmem_capacity_bytes", None)
        if cap:
            return int(cap)
    except Exception:
        pass
    return 64 * 1024 * 1024        # conservative (v7x per-core VMEM)


def _estimate_vmem(Bt, N, Dp, Hp, H, hd):
    """Rough per-grid-step VMEM footprint in bytes."""
    R = Bt * N
    hd_p = _round_up(hd, 128)
    weights = 2 * 2 * (3 * H * hd * Dp + Dp * Dp + 2 * Dp * Hp)   # bf16, double-buffered
    stream = 2 * 2 * R * Dp * 4                                   # x + out f32, double-buffered
    scratch = 2 * R * Dp + 3 * 2 * R * hd_p                       # ctx + q/k/v bf16 scratch
    live = 4 * R * (4 * Dp + 2 * Hp)                              # f32 temporaries headroom
    return weights + stream + scratch + live


def _pick_batch_tile(B, N, Dp, Hp, H, hd, budget_bytes):
    def ok(bt):
        return B % bt == 0 and ((bt * N) % 8 == 0 or bt == B)
    cands = [bt for bt in range(1, B + 1) if ok(bt)]
    fits = [bt for bt in cands if _estimate_vmem(bt, N, Dp, Hp, H, hd) <= budget_bytes]
    bt = max(fits) if fits else min(cands)
    # Keep >= 2 grid steps so the "parallel" batch-tile axis can shard across both
    # TensorCores on v7x; costs at most one extra ~0.35us step on single-TC chips.
    if bt == B and B >= 2:
        smaller = [c for c in (fits or cands) if c <= B // 2]
        if smaller:
            bt = max(smaller)
    return bt


def custom_attention_block(x, params, num_heads, batch_tile=None):
    B, N, D = x.shape
    H = num_heads
    assert D % H == 0
    hd = D // H
    Hdim = params["fc1_w"].shape[1]
    scale = hd ** -0.5

    Dp = _round_up(D, 128)
    Hp = _round_up(Hdim, 128)
    f32, bf16 = jnp.float32, jnp.bfloat16

    vmem_cap = _vmem_capacity_bytes()
    vmem_limit = min(int(vmem_cap * 0.75), 100 * 1024 * 1024)

    if batch_tile is None:
        batch_tile = _pick_batch_tile(B, N, Dp, Hp, H, hd, vmem_limit)
    Bt = batch_tile
    assert B % Bt == 0, "batch_tile must divide B"
    R = Bt * N

    def pad2(a, rows, cols, dtype):
        a = jnp.asarray(a, f32)
        return jnp.pad(a, ((0, rows - a.shape[0]), (0, cols - a.shape[1]))).astype(dtype)

    # --- parameter prep (free, outside the kernel) ---
    qkv_w = jnp.asarray(params["qkv_w"], f32)               # (D, 3D): [Q|K|V] columns

    def per_head(w):                                         # (D, D) -> (H, hd, Dp)
        w3 = w.reshape(D, H, hd).transpose(1, 2, 0)          # [h, j, d] = w[d, h*hd+j]
        return jnp.pad(w3, ((0, 0), (0, 0), (0, Dp - D))).astype(bf16)

    q_wh = per_head(qkv_w[:, 0 * D:1 * D] * scale)           # fold 1/sqrt(hd) into Q
    k_wh = per_head(qkv_w[:, 1 * D:2 * D])
    v_wh = per_head(qkv_w[:, 2 * D:3 * D])

    proj_w = pad2(params["proj_w"], Dp, Dp, bf16)
    fc1_w = pad2(params["fc1_w"], Dp, Hp, bf16)
    fc2_w = pad2(params["fc2_w"], Hp, Dp, bf16)

    n1_g = pad2(params["n1_g"], 1, Dp, f32)
    n1_b = pad2(params["n1_b"], 1, Dp, f32)
    n2_g = pad2(params["n2_g"], 1, Dp, f32)
    n2_b = pad2(params["n2_b"], 1, Dp, f32)
    proj_b = pad2(params["proj_b"], 1, Dp, f32)
    fc1_b = pad2(params["fc1_b"], 1, Hp, f32)
    fc2_b = pad2(params["fc2_b"], 1, Dp, f32)

    xf = jnp.pad(x.reshape(B * N, D).astype(f32), ((0, 0), (0, Dp - D)))

    def full_spec(a):
        zeros = (0,) * a.ndim
        return pl.BlockSpec(a.shape, lambda i: zeros)

    in_specs = [
        pl.BlockSpec((R, Dp), lambda i: (i, 0)),             # x rows for this batch tile
        full_spec(n1_g), full_spec(n1_b),
        full_spec(q_wh), full_spec(k_wh), full_spec(v_wh),
        full_spec(proj_w), full_spec(proj_b),
        full_spec(n2_g), full_spec(n2_b),
        full_spec(fc1_w), full_spec(fc1_b),
        full_spec(fc2_w), full_spec(fc2_b),
    ]
    out_spec = pl.BlockSpec((R, Dp), lambda i: (i, 0))

    kernel = functools.partial(attention_block_kernel,
                               num_heads=H, batch_tile=Bt, seq_len=N, true_dim=D)

    out_flat = pl.pallas_call(
        kernel,
        out_shape=jax.ShapeDtypeStruct((B * N, Dp), jnp.float32),
        grid=(B // Bt,),
        in_specs=in_specs,
        out_specs=out_spec,
        scratch_shapes=[
            pltpu.VMEM((R, Dp), bf16),    # per-head context slab -> one proj matmul
            pltpu.VMEM((R, hd), bf16),    # q of the current head
            pltpu.VMEM((R, hd), bf16),    # k
            pltpu.VMEM((R, hd), bf16),    # v
        ],
        compiler_params=pltpu.CompilerParams(
            dimension_semantics=("parallel",),
            vmem_limit_bytes=vmem_limit,
        ),
    )(xf,
      n1_g, n1_b,
      q_wh, k_wh, v_wh,
      proj_w, proj_b,
      n2_g, n2_b,
      fc1_w, fc1_b,
      fc2_w, fc2_b)

    return out_flat[:, :D].reshape(B, N, D)


# ------------------ plain-JAX f32 reference (PyTorch semantics) ------------------
def reference_block(x, p, num_heads):
    B, N, D = x.shape
    hd = D // num_heads
    scale = hd ** -0.5

    def ln(z, g, b):
        mu = jnp.mean(z, axis=-1, keepdims=True)
        var = jnp.mean((z - mu) ** 2, axis=-1, keepdims=True)
        return (z - mu) / jnp.sqrt(var + 1e-5) * g + b

    xn = ln(x, p["n1_g"], p["n1_b"])
    qkv = xn @ p["qkv_w"]                                     # (B, N, 3D)
    qkv = qkv.reshape(B, N, 3, num_heads, hd).transpose(2, 0, 3, 1, 4)
    q, k, v = qkv[0], qkv[1], qkv[2]                          # (B, H, N, hd)
    attn = jax.nn.softmax((q * scale) @ jnp.swapaxes(k, -2, -1), axis=-1)
    ctx = (attn @ v).transpose(0, 2, 1, 3).reshape(B, N, D)
    x1 = x + ctx @ p["proj_w"] + p["proj_b"]

    xn2 = ln(x1, p["n2_g"], p["n2_b"])
    h = xn2 @ p["fc1_w"] + p["fc1_b"]
    h = 0.5 * h * (1.0 + jax.lax.erf(h / math.sqrt(2.0)))
    return x1 + h @ p["fc2_w"] + p["fc2_b"]


if __name__ == "__main__":
    # Small shapes consistent with the module: dim=32, num_heads=4, mlp_ratio=4.
    B, N, D = 2, 8, 32
    num_heads = 4
    hidden = int(D * 4.0)

    key = jax.random.PRNGKey(0)
    ks = jax.random.split(key, 12)

    params = {
        "n1_g": 1.0 + 0.1 * jax.random.normal(ks[0], (1, D), jnp.float32),
        "n1_b": 0.1 * jax.random.normal(ks[1], (1, D), jnp.float32),
        "qkv_w": 0.02 * jax.random.normal(ks[2], (D, 3 * D), jnp.float32),
        "proj_w": 0.02 * jax.random.normal(ks[3], (D, D), jnp.float32),
        "proj_b": 0.02 * jax.random.normal(ks[4], (1, D), jnp.float32),
        "n2_g": 1.0 + 0.1 * jax.random.normal(ks[5], (1, D), jnp.float32),
        "n2_b": 0.1 * jax.random.normal(ks[6], (1, D), jnp.float32),
        "fc1_w": 0.02 * jax.random.normal(ks[7], (D, hidden), jnp.float32),
        "fc1_b": 0.02 * jax.random.normal(ks[8], (1, hidden), jnp.float32),
        "fc2_w": 0.02 * jax.random.normal(ks[9], (hidden, D), jnp.float32),
        "fc2_b": 0.02 * jax.random.normal(ks[10], (1, D), jnp.float32),
    }
    x = jax.random.normal(ks[11], (B, N, D), jnp.float32)

    out = custom_attention_block(x, params, num_heads)
    out = jax.block_until_ready(out)

    ref = jax.block_until_ready(reference_block(x, params, num_heads))
    assert out.shape == (B, N, D)
    # bf16 matmul operands (f32 accumulation) + approx reciprocal -> loose tolerance.
    err = jnp.max(jnp.abs(out - ref))
    assert jnp.allclose(out, ref, rtol=1e-2, atol=1e-2), f"max abs err {err}"

    print("KERNEL_OK")
</pallas_src>

<mosaic_0001>
module attributes {stable_mosaic.version = 11 : i64} {
  func.func @attention_block_kernel(%arg0: i32, %arg1: memref<8x128xf32, #tpu.memory_space<vmem>>, %arg2: memref<1x128xf32, #tpu.memory_space<vmem>>, %arg3: memref<1x128xf32, #tpu.memory_space<vmem>>, %arg4: memref<4x8x128xbf16, #tpu.memory_space<vmem>>, %arg5: memref<4x8x128xbf16, #tpu.memory_space<vmem>>, %arg6: memref<4x8x128xbf16, #tpu.memory_space<vmem>>, %arg7: memref<128x128xbf16, #tpu.memory_space<vmem>>, %arg8: memref<1x128xf32, #tpu.memory_space<vmem>>, %arg9: memref<1x128xf32, #tpu.memory_space<vmem>>, %arg10: memref<1x128xf32, #tpu.memory_space<vmem>>, %arg11: memref<128x128xbf16, #tpu.memory_space<vmem>>, %arg12: memref<1x128xf32, #tpu.memory_space<vmem>>, %arg13: memref<128x128xbf16, #tpu.memory_space<vmem>>, %arg14: memref<1x128xf32, #tpu.memory_space<vmem>>, %arg15: memref<8x128xf32, #tpu.memory_space<vmem>>, %arg16: memref<8x128xbf16, #tpu.memory_space<vmem>>, %arg17: memref<8x8xbf16, #tpu.memory_space<vmem>>, %arg18: memref<8x8xbf16, #tpu.memory_space<vmem>>, %arg19: memref<8x8xbf16, #tpu.memory_space<vmem>>) attributes {dimension_semantics = [#tpu.dimension_semantics<parallel>], iteration_bounds = array<i64: 2>, scalar_prefetch = 0 : i64, scratch_operands = 4 : i64, tpu.core_type = #tpu.core_type<tc>, window_params = [{transform_indices = @transform_0, window_bounds = array<i64: 8, 128>}, {pipeline_mode = #tpu.pipeline_mode<synchronous>, transform_indices = @transform_1, window_bounds = array<i64: 1, 128>}, {pipeline_mode = #tpu.pipeline_mode<synchronous>, transform_indices = @transform_2, window_bounds = array<i64: 1, 128>}, {pipeline_mode = #tpu.pipeline_mode<synchronous>, transform_indices = @transform_3, window_bounds = array<i64: 4, 8, 128>}, {pipeline_mode = #tpu.pipeline_mode<synchronous>, transform_indices = @transform_4, window_bounds = array<i64: 4, 8, 128>}, {pipeline_mode = #tpu.pipeline_mode<synchronous>, transform_indices = @transform_5, window_bounds = array<i64: 4, 8, 128>}, {pipeline_mode = #tpu.pipeline_mode<synchronous>, transform_indices = @transform_6, window_bounds = array<i64: 128, 128>}, {pipeline_mode = #tpu.pipeline_mode<synchronous>, transform_indices = @transform_7, window_bounds = array<i64: 1, 128>}, {pipeline_mode = #tpu.pipeline_mode<synchronous>, transform_indices = @transform_8, window_bounds = array<i64: 1, 128>}, {pipeline_mode = #tpu.pipeline_mode<synchronous>, transform_indices = @transform_9, window_bounds = array<i64: 1, 128>}, {pipeline_mode = #tpu.pipeline_mode<synchronous>, transform_indices = @transform_10, window_bounds = array<i64: 128, 128>}, {pipeline_mode = #tpu.pipeline_mode<synchronous>, transform_indices = @transform_11, window_bounds = array<i64: 1, 128>}, {pipeline_mode = #tpu.pipeline_mode<synchronous>, transform_indices = @transform_12, window_bounds = array<i64: 128, 128>}, {pipeline_mode = #tpu.pipeline_mode<synchronous>, transform_indices = @transform_13, window_bounds = array<i64: 1, 128>}, {transform_indices = @transform_14, window_bounds = array<i64: 8, 128>}]} {
    %c0 = arith.constant 0 : index
    %c0_0 = arith.constant 0 : index
    %0 = vector.load %arg1[%c0, %c0_0] : memref<8x128xf32, #tpu.memory_space<vmem>>, vector<8x128xf32>
    %c0_1 = arith.constant 0 : index
    %c0_2 = arith.constant 0 : index
    %1 = vector.load %arg2[%c0_1, %c0_2] : memref<1x128xf32, #tpu.memory_space<vmem>>, vector<1x128xf32>
    %c0_3 = arith.constant 0 : index
    %c0_4 = arith.constant 0 : index
    %2 = vector.load %arg3[%c0_3, %c0_4] : memref<1x128xf32, #tpu.memory_space<vmem>>, vector<1x128xf32>
    %cst = arith.constant dense<0.000000e+00> : vector<8xf32>
    %3 = vector.multi_reduction <add>, %0, %cst [1] : vector<8x128xf32> to vector<8xf32>
    %4 = vector.shape_cast %3 : vector<8xf32> to vector<8x1xf32>
    %cst_5 = arith.constant 3.125000e-02 : f32
    %5 = vector.broadcast %cst_5 : f32 to vector<8x1xf32>
    %6 = arith.mulf %4, %5 : vector<8x1xf32>
    %7 = vector.broadcast %6 : vector<8x1xf32> to vector<8x128xf32>
    %8 = arith.subf %0, %7 : vector<8x128xf32>
    %9 = tpu.iota {dimensions = array<i32: 1>} : vector<1x128xi32>
    %c32_i32 = arith.constant 32 : i32
    %10 = vector.broadcast %c32_i32 : i32 to vector<1x128xi32>
    %11 = arith.cmpi slt, %9, %10 : vector<1x128xi32>
    %cst_6 = arith.constant 0.000000e+00 : f32
    %12 = vector.shape_cast %11 : vector<1x128xi1> to vector<1x128xi1>
    %13 = vector.broadcast %12 : vector<1x128xi1> to vector<8x128xi1>
    %14 = vector.broadcast %cst_6 : f32 to vector<8x128xf32>
    %15 = arith.select %13, %8, %14 : vector<8x128xi1>, vector<8x128xf32>
    %16 = arith.mulf %15, %15 : vector<8x128xf32>
    %cst_7 = arith.constant dense<0.000000e+00> : vector<8xf32>
    %17 = vector.multi_reduction <add>, %16, %cst_7 [1] : vector<8x128xf32> to vector<8xf32>
    %18 = vector.shape_cast %17 : vector<8xf32> to vector<8x1xf32>
    %cst_8 = arith.constant 3.125000e-02 : f32
    %19 = vector.broadcast %cst_8 : f32 to vector<8x1xf32>
    %20 = arith.mulf %18, %19 : vector<8x1xf32>
    %cst_9 = arith.constant 9.99999974E-6 : f32
    %21 = vector.broadcast %cst_9 : f32 to vector<8x1xf32>
    %22 = arith.addf %20, %21 : vector<8x1xf32>
    %23 = math.rsqrt %22 : vector<8x1xf32>
    %24 = vector.broadcast %23 : vector<8x1xf32> to vector<8x128xf32>
    %25 = arith.mulf %15, %24 : vector<8x128xf32>
    %26 = vector.broadcast %1 : vector<1x128xf32> to vector<8x128xf32>
    %27 = arith.mulf %25, %26 : vector<8x128xf32>
    %28 = vector.broadcast %2 : vector<1x128xf32> to vector<8x128xf32>
    %29 = arith.addf %27, %28 : vector<8x128xf32>
    %30 = arith.truncf %29 : vector<8x128xf32> to vector<8x128xbf16>
    %cst_10 = arith.constant 0.000000e+00 : bf16
    %31 = vector.broadcast %cst_10 : bf16 to vector<8x128xbf16>
    %c0_11 = arith.constant 0 : index
    %c0_12 = arith.constant 0 : index
    %32 = vector.load %arg16[%c0_11, %c0_12] : memref<8x128xbf16, #tpu.memory_space<vmem>>, vector<8x128xbf16>
    tpu.vector_store %arg16[%c0_11, %c0_12], %31 {strides = array<i32>} : memref<8x128xbf16, #tpu.memory_space<vmem>>, vector<8x128xbf16>,
    %c0_13 = arith.constant 0 : index
    %c0_14 = arith.constant 0 : index
    %c0_15 = arith.constant 0 : index
    %33 = vector.load %arg4[%c0_13, %c0_14, %c0_15] : memref<4x8x128xbf16, #tpu.memory_space<vmem>>, vector<1x8x128xbf16>
    %34 = vector.shape_cast %33 : vector<1x8x128xbf16> to vector<8x128xbf16>
    %cst_16 = arith.constant dense<0.000000e+00> : vector<8x8xf32>
    %35 = tpu.matmul %30, %34, %cst_16 {dimension_numbers = #tpu.dot_dimension_numbers<[1], [1], [0], [0], [0, 0, 1, 0], [], []>} : vector<8x128xbf16>, vector<8x128xbf16>, vector<8x8xf32> -> vector<8x8xf32>
    %36 = arith.truncf %35 : vector<8x8xf32> to vector<8x8xbf16>
    %c0_17 = arith.constant 0 : index
    %c0_18 = arith.constant 0 : index
    %37 = vector.load %arg17[%c0_17, %c0_18] : memref<8x8xbf16, #tpu.memory_space<vmem>>, vector<8x8xbf16>
    tpu.vector_store %arg17[%c0_17, %c0_18], %36 {strides = array<i32>} : memref<8x8xbf16, #tpu.memory_space<vmem>>, vector<8x8xbf16>,
    %c0_19 = arith.constant 0 : index
    %c0_20 = arith.constant 0 : index
    %c0_21 = arith.constant 0 : index
    %38 = vector.load %arg5[%c0_19, %c0_20, %c0_21] : memref<4x8x128xbf16, #tpu.memory_space<vmem>>, vector<1x8x128xbf16>
    %39 = vector.shape_cast %38 : vector<1x8x128xbf16> to vector<8x128xbf16>
    %cst_22 = arith.constant dense<0.000000e+00> : vector<8x8xf32>
    %40 = tpu.matmul %30, %39, %cst_22 {dimension_numbers = #tpu.dot_dimension_numbers<[1], [1], [0], [0], [0, 0, 1, 0], [], []>} : vector<8x128xbf16>, vector<8x128xbf16>, vector<8x8xf32> -> vector<8x8xf32>
    %41 = arith.truncf %40 : vector<8x8xf32> to vector<8x8xbf16>
    %c0_23 = arith.constant 0 : index
    %c0_24 = arith.constant 0 : index
    %42 = vector.load %arg18[%c0_23, %c0_24] : memref<8x8xbf16, #tpu.memory_space<vmem>>, vector<8x8xbf16>
    tpu.vector_store %arg18[%c0_23, %c0_24], %41 {strides = array<i32>} : memref<8x8xbf16, #tpu.memory_space<vmem>>, vector<8x8xbf16>,
    %c0_25 = arith.constant 0 : index
    %c0_26 = arith.constant 0 : index
    %c0_27 = arith.constant 0 : index
    %43 = vector.load %arg6[%c0_25, %c0_26, %c0_27] : memref<4x8x128xbf16, #tpu.memory_space<vmem>>, vector<1x8x128xbf16>
    %44 = vector.shape_cast %43 : vector<1x8x128xbf16> to vector<8x128xbf16>
    %cst_28 = arith.constant dense<0.000000e+00> : vector<8x8xf32>
    %45 = tpu.matmul %30, %44, %cst_28 {dimension_numbers = #tpu.dot_dimension_numbers<[1], [1], [0], [0], [0, 0, 1, 0], [], []>} : vector<8x128xbf16>, vector<8x128xbf16>, vector<8x8xf32> -> vector<8x8xf32>
    %46 = arith.truncf %45 : vector<8x8xf32> to vector<8x8xbf16>
    %c0_29 = arith.constant 0 : index
    %c0_30 = arith.constant 0 : index
    %47 = vector.load %arg19[%c0_29, %c0_30] : memref<8x8xbf16, #tpu.memory_space<vmem>>, vector<8x8xbf16>
    tpu.vector_store %arg19[%c0_29, %c0_30], %46 {strides = array<i32>} : memref<8x8xbf16, #tpu.memory_space<vmem>>, vector<8x8xbf16>,
    %c0_i32 = arith.constant 0 : i32
    %c1_i32 = arith.constant 1 : i32
    %48 = arith.muli %c0_i32, %c1_i32 : i32
    %c0_i32_31 = arith.constant 0 : i32
    %49 = arith.addi %c0_i32_31, %48 : i32
    %c8_i32 = arith.constant 8 : i32
    %50 = arith.muli %49, %c8_i32 : i32
    %51 = tpu.assume_multiple %50, 8 : i32
    %52 = arith.index_cast %51 : i32 to index
    %c0_32 = arith.constant 0 : index
    %53 = vector.load %arg17[%52, %c0_32] : memref<8x8xbf16, #tpu.memory_space<vmem>>, vector<8x8xbf16>
    %54 = arith.index_cast %51 : i32 to index
    %c0_33 = arith.constant 0 : index
    %55 = vector.load %arg18[%54, %c0_33] : memref<8x8xbf16, #tpu.memory_space<vmem>>, vector<8x8xbf16>
    %56 = arith.index_cast %51 : i32 to index
    %c0_34 = arith.constant 0 : index
    %57 = vector.load %arg19[%56, %c0_34] : memref<8x8xbf16, #tpu.memory_space<vmem>>, vector<8x8xbf16>
    %cst_35 = arith.constant dense<0.000000e+00> : vector<8x8xf32>
    %58 = tpu.matmul %53, %55, %cst_35 {dimension_numbers = #tpu.dot_dimension_numbers<[1], [1], [0], [0], [0, 0, 1, 0], [], []>} : vector<8x8xbf16>, vector<8x8xbf16>, vector<8x8xf32> -> vector<8x8xf32>
    %cst_36 = arith.constant dense<0xFF800000> : vector<8xf32>
    %59 = vector.multi_reduction <maximumf>, %58, %cst_36 [1] : vector<8x8xf32> to vector<8xf32>
    %60 = vector.shape_cast %59 : vector<8xf32> to vector<8x1xf32>
    %61 = vector.broadcast %60 : vector<8x1xf32> to vector<8x8xf32>
    %62 = arith.subf %58, %61 : vector<8x8xf32>
    %63 = math.exp %62 : vector<8x8xf32>
    %cst_37 = arith.constant dense<0.000000e+00> : vector<8xf32>
    %64 = vector.multi_reduction <add>, %63, %cst_37 [1] : vector<8x8xf32> to vector<8xf32>
    %65 = vector.shape_cast %64 : vector<8xf32> to vector<8x1xf32>
    %66 = tpu.reciprocal %65 {approx = true} : vector<8x1xf32> -> vector<8x1xf32>
    %67 = vector.broadcast %66 : vector<8x1xf32> to vector<8x8xf32>
    %68 = arith.mulf %63, %67 : vector<8x8xf32>
    %69 = arith.truncf %68 : vector<8x8xf32> to vector<8x8xbf16>
    %cst_38 = arith.constant dense<0.000000e+00> : vector<8x8xf32>
    %70 = tpu.matmul %69, %57, %cst_38 {dimension_numbers = #tpu.dot_dimension_numbers<[1], [0], [0], [1], [0, 0, 1, 1], [], []>} : vector<8x8xbf16>, vector<8x8xbf16>, vector<8x8xf32> -> vector<8x8xf32>
    %71 = arith.truncf %70 : vector<8x8xf32> to vector<8x8xbf16>
    %72 = arith.index_cast %51 : i32 to index
    %c0_39 = arith.constant 0 : index
    %73 = vector.load %arg16[%72, %c0_39] : memref<8x128xbf16, #tpu.memory_space<vmem>>, vector<8x8xbf16>
    tpu.vector_store %arg16[%72, %c0_39], %71 {strides = array<i32>} : memref<8x128xbf16, #tpu.memory_space<vmem>>, vector<8x8xbf16>,
    %c1_i32_40 = arith.constant 1 : i32
    %c1 = arith.constant 1 : index
    %c0_41 = arith.constant 0 : index
    %c0_42 = arith.constant 0 : index
    %74 = vector.load %arg4[%c1, %c0_41, %c0_42] : memref<4x8x128xbf16, #tpu.memory_space<vmem>>, vector<1x8x128xbf16>
    %75 = vector.shape_cast %74 : vector<1x8x128xbf16> to vector<8x128xbf16>
    %cst_43 = arith.constant dense<0.000000e+00> : vector<8x8xf32>
    %76 = tpu.matmul %30, %75, %cst_43 {dimension_numbers = #tpu.dot_dimension_numbers<[1], [1], [0], [0], [0, 0, 1, 0], [], []>} : vector<8x128xbf16>, vector<8x128xbf16>, vector<8x8xf32> -> vector<8x8xf32>
    %77 = arith.truncf %76 : vector<8x8xf32> to vector<8x8xbf16>
    %c0_44 = arith.constant 0 : index
    %c0_45 = arith.constant 0 : index
    %78 = vector.load %arg17[%c0_44, %c0_45] : memref<8x8xbf16, #tpu.memory_space<vmem>>, vector<8x8xbf16>
    tpu.vector_store %arg17[%c0_44, %c0_45], %77 {strides = array<i32>} : memref<8x8xbf16, #tpu.memory_space<vmem>>, vector<8x8xbf16>,
    %c1_46 = arith.constant 1 : index
    %c0_47 = arith.constant 0 : index
    %c0_48 = arith.constant 0 : index
    %79 = vector.load %arg5[%c1_46, %c0_47, %c0_48] : memref<4x8x128xbf16, #tpu.memory_space<vmem>>, vector<1x8x128xbf16>
    %80 = vector.shape_cast %79 : vector<1x8x128xbf16> to vector<8x128xbf16>
    %cst_49 = arith.constant dense<0.000000e+00> : vector<8x8xf32>
    %81 = tpu.matmul %30, %80, %cst_49 {dimension_numbers = #tpu.dot_dimension_numbers<[1], [1], [0], [0], [0, 0, 1, 0], [], []>} : vector<8x128xbf16>, vector<8x128xbf16>, vector<8x8xf32> -> vector<8x8xf32>
    %82 = arith.truncf %81 : vector<8x8xf32> to vector<8x8xbf16>
    %c0_50 = arith.constant 0 : index
    %c0_51 = arith.constant 0 : index
    %83 = vector.load %arg18[%c0_50, %c0_51] : memref<8x8xbf16, #tpu.memory_space<vmem>>, vector<8x8xbf16>
    tpu.vector_store %arg18[%c0_50, %c0_51], %82 {strides = array<i32>} : memref<8x8xbf16, #tpu.memory_space<vmem>>, vector<8x8xbf16>,
    %c1_52 = arith.constant 1 : index
    %c0_53 = arith.constant 0 : index
    %c0_54 = arith.constant 0 : index
    %84 = vector.load %arg6[%c1_52, %c0_53, %c0_54] : memref<4x8x128xbf16, #tpu.memory_space<vmem>>, vector<1x8x128xbf16>
    %85 = vector.shape_cast %84 : vector<1x8x128xbf16> to vector<8x128xbf16>
    %cst_55 = arith.constant dense<0.000000e+00> : vector<8x8xf32>
    %86 = tpu.matmul %30, %85, %cst_55 {dimension_numbers = #tpu.dot_dimension_numbers<[1], [1], [0], [0], [0, 0, 1, 0], [], []>} : vector<8x128xbf16>, vector<8x128xbf16>, vector<8x8xf32> -> vector<8x8xf32>
    %87 = arith.truncf %86 : vector<8x8xf32> to vector<8x8xbf16>
    %c0_56 = arith.constant 0 : index
    %c0_57 = arith.constant 0 : index
    %88 = vector.load %arg19[%c0_56, %c0_57] : memref<8x8xbf16, #tpu.memory_space<vmem>>, vector<8x8xbf16>
    tpu.vector_store %arg19[%c0_56, %c0_57], %87 {strides = array<i32>} : memref<8x8xbf16, #tpu.memory_space<vmem>>, vector<8x8xbf16>,
    %c0_i32_58 = arith.constant 0 : i32
    %c1_i32_59 = arith.constant 1 : i32
    %89 = arith.muli %c0_i32_58, %c1_i32_59 : i32
    %c0_i32_60 = arith.constant 0 : i32
    %90 = arith.addi %c0_i32_60, %89 : i32
    %c8_i32_61 = arith.constant 8 : i32
    %91 = arith.muli %90, %c8_i32_61 : i32
    %92 = tpu.assume_multiple %91, 8 : i32
    %93 = arith.index_cast %92 : i32 to index
    %c0_62 = arith.constant 0 : index
    %94 = vector.load %arg17[%93, %c0_62] : memref<8x8xbf16, #tpu.memory_space<vmem>>, vector<8x8xbf16>
    %95 = arith.index_cast %92 : i32 to index
    %c0_63 = arith.constant 0 : index
    %96 = vector.load %arg18[%95, %c0_63] : memref<8x8xbf16, #tpu.memory_space<vmem>>, vector<8x8xbf16>
    %97 = arith.index_cast %92 : i32 to index
    %c0_64 = arith.constant 0 : index
    %98 = vector.load %arg19[%97, %c0_64] : memref<8x8xbf16, #tpu.memory_space<vmem>>, vector<8x8xbf16>
    %cst_65 = arith.constant dense<0.000000e+00> : vector<8x8xf32>
    %99 = tpu.matmul %94, %96, %cst_65 {dimension_numbers = #tpu.dot_dimension_numbers<[1], [1], [0], [0], [0, 0, 1, 0], [], []>} : vector<8x8xbf16>, vector<8x8xbf16>, vector<8x8xf32> -> vector<8x8xf32>
    %cst_66 = arith.constant dense<0xFF800000> : vector<8xf32>
    %100 = vector.multi_reduction <maximumf>, %99, %cst_66 [1] : vector<8x8xf32> to vector<8xf32>
    %101 = vector.shape_cast %100 : vector<8xf32> to vector<8x1xf32>
    %102 = vector.broadcast %101 : vector<8x1xf32> to vector<8x8xf32>
    %103 = arith.subf %99, %102 : vector<8x8xf32>
    %104 = math.exp %103 : vector<8x8xf32>
    %cst_67 = arith.constant dense<0.000000e+00> : vector<8xf32>
    %105 = vector.multi_reduction <add>, %104, %cst_67 [1] : vector<8x8xf32> to vector<8xf32>
    %106 = vector.shape_cast %105 : vector<8xf32> to vector<8x1xf32>
    %107 = tpu.reciprocal %106 {approx = true} : vector<8x1xf32> -> vector<8x1xf32>
    %108 = vector.broadcast %107 : vector<8x1xf32> to vector<8x8xf32>
    %109 = arith.mulf %104, %108 : vector<8x8xf32>
    %110 = arith.truncf %109 : vector<8x8xf32> to vector<8x8xbf16>
    %cst_68 = arith.constant dense<0.000000e+00> : vector<8x8xf32>
    %111 = tpu.matmul %110, %98, %cst_68 {dimension_numbers = #tpu.dot_dimension_numbers<[1], [0], [0], [1], [0, 0, 1, 1], [], []>} : vector<8x8xbf16>, vector<8x8xbf16>, vector<8x8xf32> -> vector<8x8xf32>
    %112 = arith.truncf %111 : vector<8x8xf32> to vector<8x8xbf16>
    %113 = arith.index_cast %92 : i32 to index
    %c8 = arith.constant 8 : index
    %114 = vector.load %arg16[%113, %c8] : memref<8x128xbf16, #tpu.memory_space<vmem>>, vector<8x8xbf16>
    tpu.vector_store %arg16[%113, %c8], %112 {strides = array<i32>} : memref<8x128xbf16, #tpu.memory_space<vmem>>, vector<8x8xbf16>,
    %c1_i32_69 = arith.constant 1 : i32
    %c2 = arith.constant 2 : index
    %c0_70 = arith.constant 0 : index
    %c0_71 = arith.constant 0 : index
    %115 = vector.load %arg4[%c2, %c0_70, %c0_71] : memref<4x8x128xbf16, #tpu.memory_space<vmem>>, vector<1x8x128xbf16>
    %116 = vector.shape_cast %115 : vector<1x8x128xbf16> to vector<8x128xbf16>
    %cst_72 = arith.constant dense<0.000000e+00> : vector<8x8xf32>
    %117 = tpu.matmul %30, %116, %cst_72 {dimension_numbers = #tpu.dot_dimension_numbers<[1], [1], [0], [0], [0, 0, 1, 0], [], []>} : vector<8x128xbf16>, vector<8x128xbf16>, vector<8x8xf32> -> vector<8x8xf32>
    %118 = arith.truncf %117 : vector<8x8xf32> to vector<8x8xbf16>
    %c0_73 = arith.constant 0 : index
    %c0_74 = arith.constant 0 : index
    %119 = vector.load %arg17[%c0_73, %c0_74] : memref<8x8xbf16, #tpu.memory_space<vmem>>, vector<8x8xbf16>
    tpu.vector_store %arg17[%c0_73, %c0_74], %118 {strides = array<i32>} : memref<8x8xbf16, #tpu.memory_space<vmem>>, vector<8x8xbf16>,
    %c2_75 = arith.constant 2 : index
    %c0_76 = arith.constant 0 : index
    %c0_77 = arith.constant 0 : index
    %120 = vector.load %arg5[%c2_75, %c0_76, %c0_77] : memref<4x8x128xbf16, #tpu.memory_space<vmem>>, vector<1x8x128xbf16>
    %121 = vector.shape_cast %120 : vector<1x8x128xbf16> to vector<8x128xbf16>
    %cst_78 = arith.constant dense<0.000000e+00> : vector<8x8xf32>
    %122 = tpu.matmul %30, %121, %cst_78 {dimension_numbers = #tpu.dot_dimension_numbers<[1], [1], [0], [0], [0, 0, 1, 0], [], []>} : vector<8x128xbf16>, vector<8x128xbf16>, vector<8x8xf32> -> vector<8x8xf32>
    %123 = arith.truncf %122 : vector<8x8xf32> to vector<8x8xbf16>
    %c0_79 = arith.constant 0 : index
    %c0_80 = arith.constant 0 : index
    %124 = vector.load %arg18[%c0_79, %c0_80] : memref<8x8xbf16, #tpu.memory_space<vmem>>, vector<8x8xbf16>
    tpu.vector_store %arg18[%c0_79, %c0_80], %123 {strides = array<i32>} : memref<8x8xbf16, #tpu.memory_space<vmem>>, vector<8x8xbf16>,
    %c2_81 = arith.constant 2 : index
    %c0_82 = arith.constant 0 : index
    %c0_83 = arith.constant 0 : index
    %125 = vector.load %arg6[%c2_81, %c0_82, %c0_83] : memref<4x8x128xbf16, #tpu.memory_space<vmem>>, vector<1x8x128xbf16>
    %126 = vector.shape_cast %125 : vector<1x8x128xbf16> to vector<8x128xbf16>
    %cst_84 = arith.constant dense<0.000000e+00> : vector<8x8xf32>
    %127 = tpu.matmul %30, %126, %cst_84 {dimension_numbers = #tpu.dot_dimension_numbers<[1], [1], [0], [0], [0, 0, 1, 0], [], []>} : vector<8x128xbf16>, vector<8x128xbf16>, vector<8x8xf32> -> vector<8x8xf32>
    %128 = arith.truncf %127 : vector<8x8xf32> to vector<8x8xbf16>
    %c0_85 = arith.constant 0 : index
    %c0_86 = arith.constant 0 : index
    %129 = vector.load %arg19[%c0_85, %c0_86] : memref<8x8xbf16, #tpu.memory_space<vmem>>, vector<8x8xbf16>
    tpu.vector_store %arg19[%c0_85, %c0_86], %128 {strides = array<i32>} : memref<8x8xbf16, #tpu.memory_space<vmem>>, vector<8x8xbf16>,
    %c0_i32_87 = arith.constant 0 : i32
    %c1_i32_88 = arith.constant 1 : i32
    %130 = arith.muli %c0_i32_87, %c1_i32_88 : i32
    %c0_i32_89 = arith.constant 0 : i32
    %131 = arith.addi %c0_i32_89, %130 : i32
    %c8_i32_90 = arith.constant 8 : i32
    %132 = arith.muli %131, %c8_i32_90 : i32
    %133 = tpu.assume_multiple %132, 8 : i32
    %134 = arith.index_cast %133 : i32 to index
    %c0_91 = arith.constant 0 : index
    %135 = vector.load %arg17[%134, %c0_91] : memref<8x8xbf16, #tpu.memory_space<vmem>>, vector<8x8xbf16>
    %136 = arith.index_cast %133 : i32 to index
    %c0_92 = arith.constant 0 : index
    %137 = vector.load %arg18[%136, %c0_92] : memref<8x8xbf16, #tpu.memory_space<vmem>>, vector<8x8xbf16>
    %138 = arith.index_cast %133 : i32 to index
    %c0_93 = arith.constant 0 : index
    %139 = vector.load %arg19[%138, %c0_93] : memref<8x8xbf16, #tpu.memory_space<vmem>>, vector<8x8xbf16>
    %cst_94 = arith.constant dense<0.000000e+00> : vector<8x8xf32>
    %140 = tpu.matmul %135, %137, %cst_94 {dimension_numbers = #tpu.dot_dimension_numbers<[1], [1], [0], [0], [0, 0, 1, 0], [], []>} : vector<8x8xbf16>, vector<8x8xbf16>, vector<8x8xf32> -> vector<8x8xf32>
    %cst_95 = arith.constant dense<0xFF800000> : vector<8xf32>
    %141 = vector.multi_reduction <maximumf>, %140, %cst_95 [1] : vector<8x8xf32> to vector<8xf32>
    %142 = vector.shape_cast %141 : vector<8xf32> to vector<8x1xf32>
    %143 = vector.broadcast %142 : vector<8x1xf32> to vector<8x8xf32>
    %144 = arith.subf %140, %143 : vector<8x8xf32>
    %145 = math.exp %144 : vector<8x8xf32>
    %cst_96 = arith.constant dense<0.000000e+00> : vector<8xf32>
    %146 = vector.multi_reduction <add>, %145, %cst_96 [1] : vector<8x8xf32> to vector<8xf32>
    %147 = vector.shape_cast %146 : vector<8xf32> to vector<8x1xf32>
    %148 = tpu.reciprocal %147 {approx = true} : vector<8x1xf32> -> vector<8x1xf32>
    %149 = vector.broadcast %148 : vector<8x1xf32> to vector<8x8xf32>
    %150 = arith.mulf %145, %149 : vector<8x8xf32>
    %151 = arith.truncf %150 : vector<8x8xf32> to vector<8x8xbf16>
    %cst_97 = arith.constant dense<0.000000e+00> : vector<8x8xf32>
    %152 = tpu.matmul %151, %139, %cst_97 {dimension_numbers = #tpu.dot_dimension_numbers<[1], [0], [0], [1], [0, 0, 1, 1], [], []>} : vector<8x8xbf16>, vector<8x8xbf16>, vector<8x8xf32> -> vector<8x8xf32>
    %153 = arith.truncf %152 : vector<8x8xf32> to vector<8x8xbf16>
    %154 = arith.index_cast %133 : i32 to index
    %c16 = arith.constant 16 : index
    %155 = vector.load %arg16[%154, %c16] : memref<8x128xbf16, #tpu.memory_space<vmem>>, vector<8x8xbf16>
    tpu.vector_store %arg16[%154, %c16], %153 {strides = array<i32>} : memref<8x128xbf16, #tpu.memory_space<vmem>>, vector<8x8xbf16>,
    %c1_i32_98 = arith.constant 1 : i32
    %c3 = arith.constant 3 : index
    %c0_99 = arith.constant 0 : index
    %c0_100 = arith.constant 0 : index
    %156 = vector.load %arg4[%c3, %c0_99, %c0_100] : memref<4x8x128xbf16, #tpu.memory_space<vmem>>, vector<1x8x128xbf16>
    %157 = vector.shape_cast %156 : vector<1x8x128xbf16> to vector<8x128xbf16>
    %cst_101 = arith.constant dense<0.000000e+00> : vector<8x8xf32>
    %158 = tpu.matmul %30, %157, %cst_101 {dimension_numbers = #tpu.dot_dimension_numbers<[1], [1], [0], [0], [0, 0, 1, 0], [], []>} : vector<8x128xbf16>, vector<8x128xbf16>, vector<8x8xf32> -> vector<8x8xf32>
    %159 = arith.truncf %158 : vector<8x8xf32> to vector<8x8xbf16>
    %c0_102 = arith.constant 0 : index
    %c0_103 = arith.constant 0 : index
    %160 = vector.load %arg17[%c0_102, %c0_103] : memref<8x8xbf16, #tpu.memory_space<vmem>>, vector<8x8xbf16>
    tpu.vector_store %arg17[%c0_102, %c0_103], %159 {strides = array<i32>} : memref<8x8xbf16, #tpu.memory_space<vmem>>, vector<8x8xbf16>,
    %c3_104 = arith.constant 3 : index
    %c0_105 = arith.constant 0 : index
    %c0_106 = arith.constant 0 : index
    %161 = vector.load %arg5[%c3_104, %c0_105, %c0_106] : memref<4x8x128xbf16, #tpu.memory_space<vmem>>, vector<1x8x128xbf16>
    %162 = vector.shape_cast %161 : vector<1x8x128xbf16> to vector<8x128xbf16>
    %cst_107 = arith.constant dense<0.000000e+00> : vector<8x8xf32>
    %163 = tpu.matmul %30, %162, %cst_107 {dimension_numbers = #tpu.dot_dimension_numbers<[1], [1], [0], [0], [0, 0, 1, 0], [], []>} : vector<8x128xbf16>, vector<8x128xbf16>, vector<8x8xf32> -> vector<8x8xf32>
    %164 = arith.truncf %163 : vector<8x8xf32> to vector<8x8xbf16>
    %c0_108 = arith.constant 0 : index
    %c0_109 = arith.constant 0 : index
    %165 = vector.load %arg18[%c0_108, %c0_109] : memref<8x8xbf16, #tpu.memory_space<vmem>>, vector<8x8xbf16>
    tpu.vector_store %arg18[%c0_108, %c0_109], %164 {strides = array<i32>} : memref<8x8xbf16, #tpu.memory_space<vmem>>, vector<8x8xbf16>,
    %c3_110 = arith.constant 3 : index
    %c0_111 = arith.constant 0 : index
    %c0_112 = arith.constant 0 : index
    %166 = vector.load %arg6[%c3_110, %c0_111, %c0_112] : memref<4x8x128xbf16, #tpu.memory_space<vmem>>, vector<1x8x128xbf16>
    %167 = vector.shape_cast %166 : vector<1x8x128xbf16> to vector<8x128xbf16>
    %cst_113 = arith.constant dense<0.000000e+00> : vector<8x8xf32>
    %168 = tpu.matmul %30, %167, %cst_113 {dimension_numbers = #tpu.dot_dimension_numbers<[1], [1], [0], [0], [0, 0, 1, 0], [], []>} : vector<8x128xbf16>, vector<8x128xbf16>, vector<8x8xf32> -> vector<8x8xf32>
    %169 = arith.truncf %168 : vector<8x8xf32> to vector<8x8xbf16>
    %c0_114 = arith.constant 0 : index
    %c0_115 = arith.constant 0 : index
    %170 = vector.load %arg19[%c0_114, %c0_115] : memref<8x8xbf16, #tpu.memory_space<vmem>>, vector<8x8xbf16>
    tpu.vector_store %arg19[%c0_114, %c0_115], %169 {strides = array<i32>} : memref<8x8xbf16, #tpu.memory_space<vmem>>, vector<8x8xbf16>,
    %c0_i32_116 = arith.constant 0 : i32
    %c1_i32_117 = arith.constant 1 : i32
    %171 = arith.muli %c0_i32_116, %c1_i32_117 : i32
    %c0_i32_118 = arith.constant 0 : i32
    %172 = arith.addi %c0_i32_118, %171 : i32
    %c8_i32_119 = arith.constant 8 : i32
    %173 = arith.muli %172, %c8_i32_119 : i32
    %174 = tpu.assume_multiple %173, 8 : i32
    %175 = arith.index_cast %174 : i32 to index
    %c0_120 = arith.constant 0 : index
    %176 = vector.load %arg17[%175, %c0_120] : memref<8x8xbf16, #tpu.memory_space<vmem>>, vector<8x8xbf16>
    %177 = arith.index_cast %174 : i32 to index
    %c0_121 = arith.constant 0 : index
    %178 = vector.load %arg18[%177, %c0_121] : memref<8x8xbf16, #tpu.memory_space<vmem>>, vector<8x8xbf16>
    %179 = arith.index_cast %174 : i32 to index
    %c0_122 = arith.constant 0 : index
    %180 = vector.load %arg19[%179, %c0_122] : memref<8x8xbf16, #tpu.memory_space<vmem>>, vector<8x8xbf16>
    %cst_123 = arith.constant dense<0.000000e+00> : vector<8x8xf32>
    %181 = tpu.matmul %176, %178, %cst_123 {dimension_numbers = #tpu.dot_dimension_numbers<[1], [1], [0], [0], [0, 0, 1, 0], [], []>} : vector<8x8xbf16>, vector<8x8xbf16>, vector<8x8xf32> -> vector<8x8xf32>
    %cst_124 = arith.constant dense<0xFF800000> : vector<8xf32>
    %182 = vector.multi_reduction <maximumf>, %181, %cst_124 [1] : vector<8x8xf32> to vector<8xf32>
    %183 = vector.shape_cast %182 : vector<8xf32> to vector<8x1xf32>
    %184 = vector.broadcast %183 : vector<8x1xf32> to vector<8x8xf32>
    %185 = arith.subf %181, %184 : vector<8x8xf32>
    %186 = math.exp %185 : vector<8x8xf32>
    %cst_125 = arith.constant dense<0.000000e+00> : vector<8xf32>
    %187 = vector.multi_reduction <add>, %186, %cst_125 [1] : vector<8x8xf32> to vector<8xf32>
    %188 = vector.shape_cast %187 : vector<8xf32> to vector<8x1xf32>
    %189 = tpu.reciprocal %188 {approx = true} : vector<8x1xf32> -> vector<8x1xf32>
    %190 = vector.broadcast %189 : vector<8x1xf32> to vector<8x8xf32>
    %191 = arith.mulf %186, %190 : vector<8x8xf32>
    %192 = arith.truncf %191 : vector<8x8xf32> to vector<8x8xbf16>
    %cst_126 = arith.constant dense<0.000000e+00> : vector<8x8xf32>
    %193 = tpu.matmul %192, %180, %cst_126 {dimension_numbers = #tpu.dot_dimension_numbers<[1], [0], [0], [1], [0, 0, 1, 1], [], []>} : vector<8x8xbf16>, vector<8x8xbf16>, vector<8x8xf32> -> vector<8x8xf32>
    %194 = arith.truncf %193 : vector<8x8xf32> to vector<8x8xbf16>
    %195 = arith.index_cast %174 : i32 to index
    %c24 = arith.constant 24 : index
    %196 = vector.load %arg16[%195, %c24] : memref<8x128xbf16, #tpu.memory_space<vmem>>, vector<8x8xbf16>
    tpu.vector_store %arg16[%195, %c24], %194 {strides = array<i32>} : memref<8x128xbf16, #tpu.memory_space<vmem>>, vector<8x8xbf16>,
    %c1_i32_127 = arith.constant 1 : i32
    %c0_128 = arith.constant 0 : index
    %c0_129 = arith.constant 0 : index
    %197 = vector.load %arg16[%c0_128, %c0_129] : memref<8x128xbf16, #tpu.memory_space<vmem>>, vector<8x128xbf16>
    %c0_130 = arith.constant 0 : index
    %c0_131 = arith.constant 0 : index
    %198 = vector.load %arg7[%c0_130, %c0_131] : memref<128x128xbf16, #tpu.memory_space<vmem>>, vector<128x128xbf16>
    %cst_132 = arith.constant dense<0.000000e+00> : vector<8x128xf32>
    %199 = tpu.matmul %197, %198, %cst_132 {dimension_numbers = #tpu.dot_dimension_numbers<[1], [0], [0], [1], [0, 0, 1, 1], [], []>} : vector<8x128xbf16>, vector<128x128xbf16>, vector<8x128xf32> -> vector<8x128xf32>
    %200 = arith.addf %0, %199 : vector<8x128xf32>
    %c0_133 = arith.constant 0 : index
    %c0_134 = arith.constant 0 : index
    %201 = vector.load %arg8[%c0_133, %c0_134] : memref<1x128xf32, #tpu.memory_space<vmem>>, vector<1x128xf32>
    %202 = vector.broadcast %201 : vector<1x128xf32> to vector<8x128xf32>
    %203 = arith.addf %200, %202 : vector<8x128xf32>
    %c0_135 = arith.constant 0 : index
    %c0_136 = arith.constant 0 : index
    %204 = vector.load %arg9[%c0_135, %c0_136] : memref<1x128xf32, #tpu.memory_space<vmem>>, vector<1x128xf32>
    %c0_137 = arith.constant 0 : index
    %c0_138 = arith.constant 0 : index
    %205 = vector.load %arg10[%c0_137, %c0_138] : memref<1x128xf32, #tpu.memory_space<vmem>>, vector<1x128xf32>
    %cst_139 = arith.constant dense<0.000000e+00> : vector<8xf32>
    %206 = vector.multi_reduction <add>, %203, %cst_139 [1] : vector<8x128xf32> to vector<8xf32>
    %207 = vector.shape_cast %206 : vector<8xf32> to vector<8x1xf32>
    %cst_140 = arith.constant 3.125000e-02 : f32
    %208 = vector.broadcast %cst_140 : f32 to vector<8x1xf32>
    %209 = arith.mulf %207, %208 : vector<8x1xf32>
    %210 = vector.broadcast %209 : vector<8x1xf32> to vector<8x128xf32>
    %211 = arith.subf %203, %210 : vector<8x128xf32>
    %212 = tpu.iota {dimensions = array<i32: 1>} : vector<1x128xi32>
    %c32_i32_141 = arith.constant 32 : i32
    %213 = vector.broadcast %c32_i32_141 : i32 to vector<1x128xi32>
    %214 = arith.cmpi slt, %212, %213 : vector<1x128xi32>
    %cst_142 = arith.constant 0.000000e+00 : f32
    %215 = vector.shape_cast %214 : vector<1x128xi1> to vector<1x128xi1>
    %216 = vector.broadcast %215 : vector<1x128xi1> to vector<8x128xi1>
    %217 = vector.broadcast %cst_142 : f32 to vector<8x128xf32>
    %218 = arith.select %216, %211, %217 : vector<8x128xi1>, vector<8x128xf32>
    %219 = arith.mulf %218, %218 : vector<8x128xf32>
    %cst_143 = arith.constant dense<0.000000e+00> : vector<8xf32>
    %220 = vector.multi_reduction <add>, %219, %cst_143 [1] : vector<8x128xf32> to vector<8xf32>
    %221 = vector.shape_cast %220 : vector<8xf32> to vector<8x1xf32>
    %cst_144 = arith.constant 3.125000e-02 : f32
    %222 = vector.broadcast %cst_144 : f32 to vector<8x1xf32>
    %223 = arith.mulf %221, %222 : vector<8x1xf32>
    %cst_145 = arith.constant 9.99999974E-6 : f32
    %224 = vector.broadcast %cst_145 : f32 to vector<8x1xf32>
    %225 = arith.addf %223, %224 : vector<8x1xf32>
    %226 = math.rsqrt %225 : vector<8x1xf32>
    %227 = vector.broadcast %226 : vector<8x1xf32> to vector<8x128xf32>
    %228 = arith.mulf %218, %227 : vector<8x128xf32>
    %229 = vector.broadcast %204 : vector<1x128xf32> to vector<8x128xf32>
    %230 = arith.mulf %228, %229 : vector<8x128xf32>
    %231 = vector.broadcast %205 : vector<1x128xf32> to vector<8x128xf32>
    %232 = arith.addf %230, %231 : vector<8x128xf32>
    %233 = arith.truncf %232 : vector<8x128xf32> to vector<8x128xbf16>
    %c0_146 = arith.constant 0 : index
    %c0_147 = arith.constant 0 : index
    %234 = vector.load %arg11[%c0_146, %c0_147] : memref<128x128xbf16, #tpu.memory_space<vmem>>, vector<128x128xbf16>
    %cst_148 = arith.constant dense<0.000000e+00> : vector<8x128xf32>
    %235 = tpu.matmul %233, %234, %cst_148 {dimension_numbers = #tpu.dot_dimension_numbers<[1], [0], [0], [1], [0, 0, 1, 1], [], []>} : vector<8x128xbf16>, vector<128x128xbf16>, vector<8x128xf32> -> vector<8x128xf32>
    %c0_149 = arith.constant 0 : index
    %c0_150 = arith.constant 0 : index
    %236 = vector.load %arg12[%c0_149, %c0_150] : memref<1x128xf32, #tpu.memory_space<vmem>>, vector<1x128xf32>
    %237 = vector.broadcast %236 : vector<1x128xf32> to vector<8x128xf32>
    %238 = arith.addf %235, %237 : vector<8x128xf32>
    %cst_151 = arith.constant 5.000000e-01 : f32
    %239 = vector.broadcast %cst_151 : f32 to vector<8x128xf32>
    %240 = arith.mulf %239, %238 : vector<8x128xf32>
    %cst_152 = arith.constant 0.707106769 : f32
    %241 = vector.broadcast %cst_152 : f32 to vector<8x128xf32>
    %242 = arith.mulf %238, %241 : vector<8x128xf32>
    %243 = math.erf %242 : vector<8x128xf32>
    %cst_153 = arith.constant 1.000000e+00 : f32
    %244 = vector.broadcast %cst_153 : f32 to vector<8x128xf32>
    %245 = arith.addf %244, %243 : vector<8x128xf32>
    %246 = arith.mulf %240, %245 : vector<8x128xf32>
    %247 = arith.truncf %246 : vector<8x128xf32> to vector<8x128xbf16>
    %c0_154 = arith.constant 0 : index
    %c0_155 = arith.constant 0 : index
    %248 = vector.load %arg13[%c0_154, %c0_155] : memref<128x128xbf16, #tpu.memory_space<vmem>>, vector<128x128xbf16>
    %cst_156 = arith.constant dense<0.000000e+00> : vector<8x128xf32>
    %249 = tpu.matmul %247, %248, %cst_156 {dimension_numbers = #tpu.dot_dimension_numbers<[1], [0], [0], [1], [0, 0, 1, 1], [], []>} : vector<8x128xbf16>, vector<128x128xbf16>, vector<8x128xf32> -> vector<8x128xf32>
    %c0_157 = arith.constant 0 : index
    %c0_158 = arith.constant 0 : index
    %250 = vector.load %arg14[%c0_157, %c0_158] : memref<1x128xf32, #tpu.memory_space<vmem>>, vector<1x128xf32>
    %251 = vector.broadcast %250 : vector<1x128xf32> to vector<8x128xf32>
    %252 = arith.addf %249, %251 : vector<8x128xf32>
    %253 = arith.addf %203, %252 : vector<8x128xf32>
    %c0_159 = arith.constant 0 : index
    %c0_160 = arith.constant 0 : index
    %254 = vector.load %arg15[%c0_159, %c0_160] : memref<8x128xf32, #tpu.memory_space<vmem>>, vector<8x128xf32>
    tpu.vector_store %arg15[%c0_159, %c0_160], %253 {strides = array<i32>} : memref<8x128xf32, #tpu.memory_space<vmem>>, vector<8x128xf32>,
    return
  }
  func.func @transform_0(%arg0: i32) -> (i32, i32) {
    %c0_i32 = arith.constant 0 : i32
    %c0_i32_0 = arith.constant 0 : i32
    return %arg0, %c0_i32 : i32, i32
  }
  func.func @transform_1(%arg0: i32) -> (i32, i32) {
    %c0_i32 = arith.constant 0 : i32
    %c0_i32_0 = arith.constant 0 : i32
    %c0_i32_1 = arith.constant 0 : i32
    return %c0_i32, %c0_i32_0 : i32, i32
  }
  func.func @transform_2(%arg0: i32) -> (i32, i32) {
    %c0_i32 = arith.constant 0 : i32
    %c0_i32_0 = arith.constant 0 : i32
    %c0_i32_1 = arith.constant 0 : i32
    return %c0_i32, %c0_i32_0 : i32, i32
  }
  func.func @transform_3(%arg0: i32) -> (i32, i32, i32) {
    %c0_i32 = arith.constant 0 : i32
    %c0_i32_0 = arith.constant 0 : i32
    %c0_i32_1 = arith.constant 0 : i32
    %c0_i32_2 = arith.constant 0 : i32
    return %c0_i32, %c0_i32_0, %c0_i32_1 : i32, i32, i32
  }
  func.func @transform_4(%arg0: i32) -> (i32, i32, i32) {
    %c0_i32 = arith.constant 0 : i32
    %c0_i32_0 = arith.constant 0 : i32
    %c0_i32_1 = arith.constant 0 : i32
    %c0_i32_2 = arith.constant 0 : i32
    return %c0_i32, %c0_i32_0, %c0_i32_1 : i32, i32, i32
  }
  func.func @transform_5(%arg0: i32) -> (i32, i32, i32) {
    %c0_i32 = arith.constant 0 : i32
    %c0_i32_0 = arith.constant 0 : i32
    %c0_i32_1 = arith.constant 0 : i32
    %c0_i32_2 = arith.constant 0 : i32
    return %c0_i32, %c0_i32_0, %c0_i32_1 : i32, i32, i32
  }
  func.func @transform_6(%arg0: i32) -> (i32, i32) {
    %c0_i32 = arith.constant 0 : i32
    %c0_i32_0 = arith.constant 0 : i32
    %c0_i32_1 = arith.constant 0 : i32
    return %c0_i32, %c0_i32_0 : i32, i32
  }
  func.func @transform_7(%arg0: i32) -> (i32, i32) {
    %c0_i32 = arith.constant 0 : i32
    %c0_i32_0 = arith.constant 0 : i32
    %c0_i32_1 = arith.constant 0 : i32
    return %c0_i32, %c0_i32_0 : i32, i32
  }
  func.func @transform_8(%arg0: i32) -> (i32, i32) {
    %c0_i32 = arith.constant 0 : i32
    %c0_i32_0 = arith.constant 0 : i32
    %c0_i32_1 = arith.constant 0 : i32
    return %c0_i32, %c0_i32_0 : i32, i32
  }
  func.func @transform_9(%arg0: i32) -> (i32, i32) {
    %c0_i32 = arith.constant 0 : i32
    %c0_i32_0 = arith.constant 0 : i32
    %c0_i32_1 = arith.constant 0 : i32
    return %c0_i32, %c0_i32_0 : i32, i32
  }
  func.func @transform_10(%arg0: i32) -> (i32, i32) {
    %c0_i32 = arith.constant 0 : i32
    %c0_i32_0 = arith.constant 0 : i32
    %c0_i32_1 = arith.constant 0 : i32
    return %c0_i32, %c0_i32_0 : i32, i32
  }
  func.func @transform_11(%arg0: i32) -> (i32, i32) {
    %c0_i32 = arith.constant 0 : i32
    %c0_i32_0 = arith.constant 0 : i32
    %c0_i32_1 = arith.constant 0 : i32
    return %c0_i32, %c0_i32_0 : i32, i32
  }
  func.func @transform_12(%arg0: i32) -> (i32, i32) {
    %c0_i32 = arith.constant 0 : i32
    %c0_i32_0 = arith.constant 0 : i32
    %c0_i32_1 = arith.constant 0 : i32
    return %c0_i32, %c0_i32_0 : i32, i32
  }
  func.func @transform_13(%arg0: i32) -> (i32, i32) {
    %c0_i32 = arith.constant 0 : i32
    %c0_i32_0 = arith.constant 0 : i32
    %c0_i32_1 = arith.constant 0 : i32
    return %c0_i32, %c0_i32_0 : i32, i32
  }
  func.func @transform_14(%arg0: i32) -> (i32, i32) {
    %c0_i32 = arith.constant 0 : i32
    %c0_i32_0 = arith.constant 0 : i32
    return %arg0, %c0_i32 : i32, i32
  }
}

</mosaic_0001>

<bundles_post_ra>
// kernel: tpu_custom_call.1
= control target key start
LH: loop header
LB: loop body
LE: loop exit
PB: predicated region body
PF: predicated region fallthrough
CT: control target
= control target key end

     0   :  { %s3401_s0 = inlined_call_operand.hbm [shape: f32[16,128], index: 0, kind: input, shape index: {}]   ;;  %s3402_s1 = inlined_call_operand.vmem [shape: f32[1,128], index: 1, kind: input, shape index: {}]   ;;  %s3403_s2 = inlined_call_operand.vmem [shape: f32[1,128], index: 2, kind: input, shape index: {}]   ;;  %s3404_s3 = inlined_call_operand.hbm [shape: bf16[4,8,128], index: 3, kind: input, shape index: {}]   ;;  %s3405_s4 = inlined_call_operand.hbm [shape: bf16[4,8,128], index: 4, kind: input, shape index: {}]   ;;  %s3406_s5 = inlined_call_operand.vmem [shape: bf16[4,8,128], index: 5, kind: input, shape index: {}]   ;;  %s3407_s6 = inlined_call_operand.hbm [shape: bf16[128,128], index: 6, kind: input, shape index: {}]   ;;  %s3408_s7 = inlined_call_operand.vmem [shape: f32[1,128], index: 7, kind: input, shape index: {}]   ;;  %s3409_s8 = inlined_call_operand.vmem [shape: f32[1,128], index: 8, kind: input, shape index: {}]   ;;  %s3410_s9 = inlined_call_operand.vmem [shape: f32[1,128], index: 9, kind: input, shape index: {}]   ;;  %s3411_s10 = inlined_call_operand.hbm [shape: bf16[128,128], index: 10, kind: input, shape index: {}]   ;;  %s3412_s11 = inlined_call_operand.vmem [shape: f32[1,128], index: 11, kind: input, shape index: {}]   ;;  %s3413_s12 = inlined_call_operand.hbm [shape: bf16[128,128], index: 12, kind: input, shape index: {}]   ;;  %s3414_s13 = inlined_call_operand.vmem [shape: f32[1,128], index: 13, kind: input, shape index: {}]   ;;  %s3415_s14 = inlined_call_operand.hbm [shape: f32[16,128], index: 14, kind: output, shape index: {}]  }
   0x1   :  { %3420 = sst [smem:[#allocation23_spill]] %s3404_s3 }
   0x2   :  { %3421 = sst [smem:[#allocation24_spill]] %s3408_s7 }
   0x3   :  { %3422 = sst [smem:[#allocation25_spill]] %s3409_s8 }
   0x4   :  { %3423 = sst [smem:[#allocation26_spill]] %s3410_s9 }
   0x5   :  { %3424 = sst [smem:[#allocation27_spill]] %s3412_s11 }
   0x6   :  { %3425 = sst [smem:[#allocation28_spill]] %s3414_s13 }
   0x7   :  { %3426 = sst [smem:[#allocation29_spill]] %s3415_s14 }
   0x8   :  { %19 = vsyncpa [#allocation7], 0 }
   0x9   :  { %21 = vsyncpa [#allocation7 + $0x1], 0 }
   0xa   :  { %22 = vsyncpa [#allocation10], 0 }
   0xb   :  { %23 = vsyncpa [#allocation13], 0 }
   0xc   :  { %24 = vsyncpa [#allocation16], 0 }
   0xd   :  { %25 = vsyncpa [#allocation8], 0 }
   0xe   :  { %27 = vsyncpa [#allocation8 + $0x1], 0  ;;  %s2891_s29 = smov 0   ;;  %s2893_s30 = smov 0  }
   0xf   :  { %s2895_s15 = smov 0   ;;  %s2897_s16 = smov 0  }
  0x10 LB: > { %s2801_s17 = smov [#allocation9]   ;;  %s2912_s19 = sadd.s32 4294967295, %s2799_s16   ;;  %s2799_s16 = sphi %s2897_s16, %s3455_s16   ;;  %s2795_s15 = sphi %s2895_s15, %s3454_s15   ;;  %s2791_s30 = sphi %s2893_s30, %s3453_s30   ;;  %s2787_s29 = sphi %s2891_s29, %s3452_s29  }
  0x11   : > { %s381_s18 = sshll.u32 %s2801_s17, 4  ;;  %p2084_p0 = scmp.ge.s32.totalorder %s2799_s16, 1  ;;  %s2917_s18 = int_to_ptr.vmem [resolvable:$true] %s381_s18 }
  0x12   : > { %p3417_p1 = scmp.eq.s32.totalorder %s2912_s19, 0  ;;  %p363_p2 = scmp.lt.s32.totalorder %s2799_s16, 3 }
  0x13   : > { %s2802_s21 = smov [#allocation12]   ;;  %s2803_s24 = smov [#allocation11]  }
  0x14   : > { %p2919_p3 = pnand %p2084_p0, %p363_p2  ;;  %s410_s22 = sshll.u32 %s2802_s21, 4  ;;  %s2932_s22 = int_to_ptr.vmem [resolvable:$true] %s410_s22 }
  0x15   : > { %s394_s25 = sshll.u32 %s2803_s24, 4  ;;  %s3429_s3 = sld [smem:[#allocation23_spill]]  ;;  %s2934_s25 = int_to_ptr.vmem [resolvable:$true] %s394_s25 }
  0x16   : > { %s3427_s20 = scalar_select %p2919_p3, 1, 0 }
  0x17   : > { %p2424_p5 = pneg %p2919_p3 }
  0x19   : > { %p2928_p6 = pnand %p2424_p5, %p3417_p1 }
  0x1b   : > { %s2551_s28 = scalar_lea.hbm %s3429_s3, 256  ;;  %p2944_p8 = pneg %p2928_p6 }
  0x1c   : > { %p2552_p7 = scmp.ne.s32.totalorder %s3429_s3, %s2551_s28  ;;  %p2558_p11 = scmp.lt.u32.totalorder %s2551_s28, %s3429_s3 }
  0x1e   : > { %p2554_p9 = pnand %p2944_p8, %p2552_p7 }
  0x20   : > { %p2555_p10 = pneg %p2554_p9 }
  0x22   : > { %p2560_p12 = pnand %p2558_p11, %p2555_p10 }
  0x24   : > { %2563 = shalt.err (!%p2560_p12)
}
  0x25   : > { %s2564_s14 = scalar_lea.vmem %s2917_s18, 256  ;;  %p2572_p5 = scmp.lt.s32.totalorder %s2917_s18, %s2917_s18 }
  0x26   : > { %p2565_p13 = scmp.ne.s32.totalorder %s2917_s18, %s2564_s14  ;;  %p2573_p4 = scmp.lt.s32.totalorder %s2564_s14, %s2564_s14 }
  0x28   : > { %p2567_p0 = pnand %p2565_p13, %p2944_p8  ;;  %p2574_p7 = por %p2573_p4, %p2572_p5 }
  0x2a   : > { %p2568_p2 = pneg %p2567_p0 }
  0x2c   : > { %p2575_p9 = pnand %p2574_p7, %p2568_p2 }
  0x2e   : > { %2578 = shalt.err (!%p2575_p9)
}
  0x2f   : > { %s2804_s26 = smov 64   ;;  %s2805_s13 = smov 4  }
  0x30   : > { %2427 = dma.hbm_to_vmem [thread:$0]  (!%p2928_p6), %s3429_s3, 256, %s2917_s18, [#allocation10], %s2804_s26, %s2804_s26, %s2805_s13  }
  0x31   : > { %s2579_s14 = scalar_lea.hbm %s3407_s6, 1024 }
  0x32   : > { %p2580_p4 = scmp.ne.s32.totalorder %s3407_s6, %s2579_s14  ;;  %p2586_p12 = scmp.lt.u32.totalorder %s2579_s14, %s3407_s6 }
  0x34   : > { %p2582_p10 = pnand %p2580_p4, %p2944_p8 }
  0x36   : > { %p2583_p11 = pneg %p2582_p10 }
  0x38   : > { %p2588_p13 = pnand %p2586_p12, %p2583_p11 }
  0x3a   : > { %2591 = shalt.err (!%p2588_p13)
}
  0x3b   : > { %s2592_s18 = scalar_lea.vmem %s2932_s22, 1024  ;;  %p2600_p7 = scmp.lt.s32.totalorder %s2932_s22, %s2932_s22 }
  0x3c   : > { %p2593_p0 = scmp.ne.s32.totalorder %s2932_s22, %s2592_s18  ;;  %p2601_p9 = scmp.lt.s32.totalorder %s2592_s18, %s2592_s18 }
  0x3e   : > { %p2595_p2 = pnand %p2593_p0, %p2944_p8  ;;  %p2602_p4 = por %p2601_p9, %p2600_p7 }
  0x40   : > { %p2596_p5 = pneg %p2595_p2 }
  0x42   : > { %p2603_p10 = pnand %p2602_p4, %p2596_p5 }
  0x44   : > { %2606 = shalt.err (!%p2603_p10)
}
  0x45   : > { %2433 = dma.hbm_to_vmem [thread:$0]  (!%p2928_p6), %s3407_s6, 1024, %s2932_s22, [#allocation13], %s2804_s26, %s2804_s26, %s2805_s13  }
  0x46   : > { %s2607_s27 = scalar_lea.hbm %s3405_s4, 256 }
  0x47   : > { %p2608_p11 = scmp.ne.s32.totalorder %s3405_s4, %s2607_s27  ;;  %p2614_p0 = scmp.lt.u32.totalorder %s2607_s27, %s3405_s4 }
  0x49   : > { %p2610_p12 = pnand %p2608_p11, %p2944_p8 }
  0x4b   : > { %p2611_p13 = pneg %p2610_p12 }
  0x4d   : > { %p2616_p2 = pnand %p2614_p0, %p2611_p13 }
  0x4f   : > { %2619 = shalt.err (!%p2616_p2)
}
  0x50   : > { %s2620_s22 = scalar_lea.vmem %s2934_s25, 256  ;;  %p2628_p4 = scmp.lt.s32.totalorder %s2934_s25, %s2934_s25 }
  0x51   : > { %p2621_p5 = scmp.ne.s32.totalorder %s2934_s25, %s2620_s22  ;;  %p2629_p10 = scmp.lt.s32.totalorder %s2620_s22, %s2620_s22 }
  0x53   : > { %p2623_p7 = pnand %p2621_p5, %p2944_p8  ;;  %p2630_p11 = por %p2629_p10, %p2628_p4 }
  0x55   : > { %p2624_p9 = pneg %p2623_p7 }
  0x57   : > { %p2631_p12 = pnand %p2630_p11, %p2624_p9 }
  0x59   : > { %2634 = shalt.err (!%p2631_p12)
}
  0x5a   : > { %2430 = dma.hbm_to_vmem [thread:$0]  (!%p2928_p6), %s3405_s4, 256, %s2934_s25, [#allocation10], %s2804_s26, %s2804_s26, %s2805_s13  }
  0x5b   : > { %s2806_s8 = smov [#allocation14]   ;;  %s2807_s11 = smov [#allocation15]  }
  0x5c   : > { %s432_s9 = sshll.u32 %s2806_s8, 4  ;;  %s448_s27 = sshll.u32 %s2807_s11, 4  ;;  %s433_s9 = int_to_ptr.vmem [resolvable:$true] %s432_s9  ;;  %s449_s27 = int_to_ptr.vmem [resolvable:$true] %s448_s27 }
  0x5d   : > { %s2635_s24 = scalar_lea.hbm %s3411_s10, 1024 }
  0x5e   : > { %p2636_p13 = scmp.ne.s32.totalorder %s3411_s10, %s2635_s24  ;;  %p2642_p5 = scmp.lt.u32.totalorder %s2635_s24, %s3411_s10 }
  0x60   : > { %p2638_p0 = pnand %p2636_p13, %p2944_p8 }
  0x62   : > { %p2639_p2 = pneg %p2638_p0 }
  0x64   : > { %p2644_p7 = pnand %p2642_p5, %p2639_p2 }
  0x66   : > { %2647 = shalt.err (!%p2644_p7)
}
  0x67   : > { %s2648_s25 = scalar_lea.vmem %s433_s9, 1024  ;;  %p2656_p11 = scmp.lt.s32.totalorder %s433_s9, %s433_s9 }
  0x68   : > { %p2649_p9 = scmp.ne.s32.totalorder %s433_s9, %s2648_s25  ;;  %p2657_p12 = scmp.lt.s32.totalorder %s2648_s25, %s2648_s25 }
  0x6a   : > { %p2651_p4 = pnand %p2649_p9, %p2944_p8  ;;  %p2658_p1 = por %p2657_p12, %p2656_p11 }
  0x6c   : > { %p2652_p10 = pneg %p2651_p4 }
  0x6e   : > { %p2659_p3 = pnand %p2658_p1, %p2652_p10 }
  0x70   : > { %2662 = shalt.err (!%p2659_p3)
}
  0x71   : > { %2436 = dma.hbm_to_vmem [thread:$0]  (!%p2928_p6), %s3411_s10, 1024, %s433_s9, [#allocation13], %s2804_s26, %s2804_s26, %s2805_s13  }
  0x72   : > { %s2663_s28 = scalar_lea.hbm %s3413_s12, 1024 }
  0x73   : > { %p2664_p1 = scmp.ne.s32.totalorder %s3413_s12, %s2663_s28  ;;  %p2670_p0 = scmp.lt.u32.totalorder %s2663_s28, %s3413_s12 }
  0x75   : > { %p2666_p3 = pnand %p2664_p1, %p2944_p8 }
  0x77   : > { %p2667_p13 = pneg %p2666_p3 }
  0x79   : > { %p2672_p2 = pnand %p2670_p0, %p2667_p13 }
  0x7b   : > { %2675 = shalt.err (!%p2672_p2)
}
  0x7c   : > { %s2676_s18 = scalar_lea.vmem %s449_s27, 1024  ;;  %p2684_p4 = scmp.lt.s32.totalorder %s449_s27, %s449_s27 }
  0x7d   : > { %p2677_p5 = scmp.ne.s32.totalorder %s449_s27, %s2676_s18  ;;  %p2685_p10 = scmp.lt.s32.totalorder %s2676_s18, %s2676_s18 }
  0x7f   : > { %p2679_p7 = pnand %p2677_p5, %p2944_p8  ;;  %p2686_p11 = por %p2685_p10, %p2684_p4 }
  0x81   : > { %p2680_p9 = pneg %p2679_p7 }
  0x83   : > { %p2687_p12 = pnand %p2686_p11, %p2680_p9 }
  0x85   : > { %2690 = shalt.err (!%p2687_p12)
}
  0x86   : > { %2439 = dma.hbm_to_vmem [thread:$0]  (!%p2928_p6), %s3413_s12, 1024, %s449_s27, [#allocation16], %s2804_s26, %s2804_s26, %s2805_s13  }
  0x87   : > { %s2083_s23 = sadd.s32 4294967294, %s2799_s16   ;;  %s3064_s21 = sadd.s32 1, %s2799_s16  }
  0x88   : > { %s40_s3 = sadd.s32 1, %s2795_s15  ;;  %s37_s7 = ssub.s32 %s2799_s16, %s3064_s21 }
  0x89   : > { %p47_p8 = scmp.ne.s32.totalorder %s2795_s15, %s2791_s30  ;;  %p38_p1 = scmp.eq.s32.totalorder %s37_s7, 0 }
  0x8a   : > { %p48_p3 = scmp.eq.s32.totalorder %s2799_s16, 0  ;;  %p53_p13 = scmp.ne.s32.totalorder %s2791_s30, %s2787_s29 }
  0x8b   : > { %p350_p0 = scmp.eq.s32.totalorder %s2912_s19, 1  ;;  %p3431_p5 = scmp.eq.s32.totalorder %s2912_s19, 0 }
  0x8c   : > { %s3076_s8 = scalar_select %p38_p1, %s2795_s15, %s40_s3  }
  0x8d   : > { %p49_p2 = por %p48_p3, %p47_p8  ;;  %p3080_p7 = por %p3431_p5, %p53_p13 }
  0x8e   : > { %p3084_p6 = por %p350_p0, %p47_p8  ;;  %p356_p9 = scmp.eq.s32.totalorder %s2083_s23, 1 }
  0x8f   : > { %p2453_p4 = scmp.lt.s32.totalorder %s2799_s16, 2  ;;  %s465_s13 = sand.u32 1, %s2795_s15  }
  0x90   : > { %s3433_s26 = scalar_select %p3084_p6, 1, 0 }
  0x91   : > { %p3090_p10 = por %p356_p9, %p53_p13  ;;  %s2091_s28 = sshll.u32 %s465_s13, 3 }
  0x92   : > { %s2092_s17 = sshll.u32 %s2799_s16, 7  ;;  %s469_s18 = scalar_lea.vmem [#allocation6], %s2091_s28 }
  0x93   : > { %s3434_s27 = scalar_select %p3090_p10, 1, 0 }
  0x94   : > { %s3098_s22 = scalar_lea.hbm %s3401_s0, %s2092_s17  ;;  %s476_s9 = sshll.u32 %s469_s18, 4  ;;  %s3104_s9 = int_to_ptr.vmem [resolvable:$true] %s476_s9 }
  0x95   : > { %p3100_p11 = pnand %p2453_p4, %p49_p2  ;;  %s466_s23 = scalar_lea.sflag [#allocation7], %s465_s13 }
  0x96   : > { %s2691_s3 = scalar_lea.hbm %s3098_s22, 128  ;;  %s2696_s17 = scalar_lea.hbm %s3401_s0, 256 }
  0x97   : > { %p2692_p12 = scmp.ne.s32.totalorder %s3098_s22, %s2691_s3  ;;  %p2693_p8 = pneg %p3100_p11 }
  0x98   : > { %p2697_p13 = scmp.lt.u32.totalorder %s3098_s22, %s3401_s0  ;;  %p2698_p0 = scmp.lt.u32.totalorder %s2696_s17, %s2691_s3 }
  0x99   : > { %p2694_p1 = pnand %p2693_p8, %p2692_p12  ;;  %p2700_p5 = scmp.lt.u32.totalorder %s2691_s3, %s3098_s22 }
  0x9a   : > { %p2699_p2 = por %p2698_p0, %p2697_p13 }
  0x9b   : > { %p2695_p3 = pneg %p2694_p1 }
  0x9c   : > { %p2701_p9 = por %p2700_p5, %p2699_p2 }
  0x9e   : > { %p2702_p4 = pnand %p2701_p9, %p2695_p3 }
  0xa0   : > { %2705 = shalt.err (!%p2702_p4)
}
  0xa1   : > { %s2706_s13 = scalar_lea.vmem %s3104_s9, 128  ;;  %s2808_s18 = smov [#allocation6]  }
  0xa2   : > { %p2707_p12 = scmp.ne.s32.totalorder %s3104_s9, %s2706_s13  ;;  %s2711_s7 = sshll.u32 %s2808_s18, 4  ;;  %s2712_s7 = int_to_ptr.vmem [resolvable:$false] %s2711_s7 }
  0xa3   : > { %s2713_s28 = scalar_lea.vmem %s2712_s7, 256  ;;  %p2714_p6 = scmp.lt.s32.totalorder %s3104_s9, %s2712_s7 }
  0xa4   : > { %p2709_p1 = pnand %p2707_p12, %p2693_p8  ;;  %p2715_p13 = scmp.lt.s32.totalorder %s2713_s28, %s2706_s13 }
  0xa6   : > { %p2710_p10 = pneg %p2709_p1  ;;  %p2716_p0 = por %p2715_p13, %p2714_p6 }
  0xa8   : > { %p2717_p2 = pnand %p2716_p0, %p2710_p10 }
  0xaa   : > { %2720 = shalt.err (!%p2717_p2)
}
  0xab   : > { %2443 = dma.hbm_to_vmem [thread:$0]  (!%p3100_p11), %s3098_s22, 128, %s3104_s9, %s466_s23  }
  0xac   : > { %p3436_p3 = scmp.ne.s32.totalorder %s3427_s20, 0 }
  0xad   : > { %s3134_s3 = sand.u32 (!%p3436_p3), 1, %s2791_s30  }
  0xae   : > { %485 = sbr.rel (%p3436_p3) target bundleno = 4900 (0x1324), region = 76  ;;  %s2094_s17 = sshll.u32 (!%p3436_p3), %s3134_s3, 3 }
  0xaf   : > { %s488_s24 = scalar_lea.sflag (!%p3436_p3), [#allocation7], %s3134_s3  ;;  %s491_s14 = scalar_lea.vmem (!%p3436_p3), [#allocation6], %s2094_s17 }
  0xb5   : > { %2766 = dma.done.wait (%p3080_p7), %s488_s24, 128  }
  0xb6   : > { %2768 = vsyncadd (%p3080_p7), %s488_s24, 4294967168  ;;  %p3437_p6 = scmp.eq.s32.totalorder %s2912_s19, 0 }
  0xb8   : > { %2770 = dma.done.wait (%p3437_p6), [#allocation10], 512   ;;  %p3438_p10 = pmov %p3437_p6 }
  0xb9   : > { %p3439_p11 = pmov %p3437_p6 }
  0xba   : > { %2772 = vsyncadd (%p3438_p10), [#allocation10], 4294966784 }
  0xbb   : > { %2774 = dma.done.wait (%p3439_p11), [#allocation13], 2048   ;;  %p3440_p8 = pmov %p3437_p6 }
  0xbc   : > { %p3441_p5 = pmov %p3437_p6 }
  0xbd   : > { %2776 = vsyncadd (%p3440_p8), [#allocation13], 4294965248 }
  0xbe   : > { %2778 = dma.done.wait (%p3441_p5), [#allocation16], 1024   ;;  %p3442_p9 = pmov %p3441_p5 }
  0xbf   : > { %v3156_v0 = vld [vmem:[%s491_s14] sm:$0xff]  ;;  %v564_v1 = vlaneseq  ;;  %v2809_v8 = vmov 0.0   ;;  %v593_v9 = vld [vmem:[#allocation9] sm:$0xf]  ;;  %vm2810_vm1 = vmmov 0   ;;  %vm635_vm2 = vcmask 60416  }
  0xc0   : > { %2780 = vsyncadd (%p3442_p9), [#allocation16], 4294966272  ;;  %560 = vadd.xlane.f32.xlu0 %v3156_v0  ;;  %2220 = vmatprep.subr.bf16.mxu1 %v2809_v8  ;;  %v2101_v14 = vld [vmem:[%s3402_s1] ss:$0 sm:$0xff]  ;;  %v637_v20 = vld [vmem:[#allocation11] sm:$0xf] }
  0xc1   : > { %v3159_v2 = vand.u32 127, %v564_v1  ;;  %2244 = vmatprep.subr.bf16.mxu0 %v2809_v8  ;;  %2221 = vmatpush3.bf16.xpose.msra.mxu1 %v593_v9  ;;  %v2102_v16 = vld [vmem:[%s3403_s2] ss:$0 sm:$0xff]  ;;  %vm726_vm3 = vcmask 64512   ;;  %vm788_vm4 = vcmask 1043456   ;;  %s2812_s20 = smov 8  }
  0xc2   : > { %2226 = vmatprep.subr.bf16.mxu1 %v2809_v8  ;;  %2222 = vmatprep.mubr.msk.bf16.mxu1 %vm2810_vm1, %v2809_v8  ;;  %v680_v21 = vld [vmem:[%s3406_s5] sm:$0xf]  ;;  %v835_v39 = vld [vmem:[#allocation9 + $0x4] sm:$0xf]  ;;  %v879_v9 = vld [vmem:[#allocation11 + $0x4] sm:$0xf] }
  0xc3   : > { %vm566_vm0 = vcmp.lt.s32.totalorder %v3159_v2, 32  ;;  %2246 = vmatprep.mubr.msk.bf16.mxu0 %vm2810_vm1, %v2809_v8  ;;  %v2105_v43 = vld [vmem:[%s3406_s5 + $0x4] sm:$0xf]  ;;  %vm1080_vm5 = vcmask 126016   ;;  %s2813_s11 = smov 16   ;;  %vm1328_vm6 = vcmask 191616  }
  0xc4   : > { %s2814_s22 = smov 24   ;;  %vm1576_vm7 = vcmask 257216   ;;  %s3443_s23 = sld [smem:[#allocation24_spill]]  ;;  %v2519_v2 = vld [vmem:[#allocation14 + $0x30] sm:$0xff]  }
  0xc5   : > { %s3444_s7 = sld [smem:[#allocation25_spill]]  ;;  %s3445_s14 = sld [smem:[#allocation26_spill]] }
  0xc6   : > { %s2147_s13 = sshll.u32 %s2912_s19, 7  ;;  %s555_s18 = scalar_lea.vmem [#allocation17], %s2094_s17 }
  0xc7   : > { %s1952_s19 = scalar_lea.sflag [#allocation8], %s3134_s3  ;;  %p3449_p4 = scmp.ne.s32.totalorder %s3433_s26, 0 }
 0x14d   : > { %v561_v3 = vpop.xlane.xlu0 %560 }
 0x14e   : > { %v562_v4 = vmul.f32 0.03125, %v561_v3 }
 0x150   : > { %v563_v5 = vsub.f32 %v3156_v0, %v562_v4 }
 0x152   : > { %v569_v6 = vsel %vm566_vm0, %v563_v5, 0.0 }
 0x153   : > { %v570_v7 = vmul.f32 %v569_v6, %v569_v6 }
 0x155   : > { %571 = vadd.xlane.f32.xlu0 %v570_v7 }
 0x1e2   : > { %v572_v10 = vpop.xlane.xlu0 %571 }
 0x1e3   : > { %v573_v11 = vmul.f32 0.03125, %v572_v10  ;;  %v2811_v10 = vmov 0  }
 0x1e4   : > { %592 = vst [vmem:[#allocation2] sm:$0xf] %v2811_v10 }
 0x1e5   : > { %v574_v12 = vadd.f32 1e-05, %v573_v11 }
 0x1e7   : > { %2529 = vrsqrt.f32 %v574_v12 }
 0x1f1   : > { %v2530_v13 = vpop.eup %2529 }
 0x1f2   : > { %v576_v15 = vmul.f32 %v2530_v13, %v569_v6 }
 0x1f4   : > { %v583_v17 = vmul.f32 %v2101_v14, %v576_v15 }
 0x1f6   : > { %v590_v18 = vadd.f32 %v2102_v16, %v583_v17 }
 0x1f8   : > { %v3178_v19 = vpack.c.bf16 %v590_v18, %v590_v18 }
 0x1fa   : > { %2223 = vmatmul.mubr.bf16.vlgmr.msra.gmra.mrb[0].mxu1 %v3178_v19 }
 0x1fb   : > { %2227 = vmatpush3.bf16.xpose.msra.mxu1 %v637_v20  ;;  %2228 = vmatprep.mubr.msk.bf16.mxu1 %vm2810_vm1, %v2809_v8 }
 0x1fc   : > { %2232 = vmatprep.subr.bf16.mxu1 %v2809_v8 }
 0x202   : > { %2229 = vmatmul.mubr.bf16.vlgmr.msra.gmra.mrb[4].mxu1 %v3178_v19 }
 0x203   : > { %2233 = vmatpush3.bf16.xpose.msra.mxu1 %v680_v21  ;;  %2234 = vmatprep.mubr.msk.bf16.mxu1 %vm2810_vm1, %v2809_v8 }
 0x204   : > { %2238 = vmatprep.subr.bf16.mxu1 %v2809_v8 }
 0x20a   : > { %2235 = vmatmul.mubr.bf16.vlgmr.msra.gmra.mrb[8].mxu1 %v3178_v19 }
 0x20b   : > { %2240 = vmatprep.mubr.msk.bf16.mxu1 %vm2810_vm1, %v2809_v8 }
 0x2cd   : > { %v628_v22 = vpop.f32.mrb[0].mxu1 }
 0x2ce   : > { %v634_v23 = vpack.c.bf16 %v628_v22, %v628_v22  ;;  %v2224_v24 = vpop.f32.mrb[1].mxu1 }
 0x2cf   : > { %v631_v25 = vpop.f32.mrb[2].mxu1  ;;  %v1083_v24 = vld [vmem:[#allocation9 + $0x8] sm:$0xf] }
 0x2d0   : > { %636 = vst.msk [vmem:[#allocation3] sm:$0xf] %vm635_vm2, %v634_v23  ;;  %v2225_v26 = vpop.f32.mrb[3].mxu1 }
 0x2d1   : > { %v2109_v26 = vld [vmem:[%s3406_s5 + $0x8] sm:$0xf] }
 0x2d5   : > { %v672_v27 = vpop.f32.mrb[4].mxu1 }
 0x2d6   : > { %v678_v28 = vpack.c.bf16 %v672_v27, %v672_v27  ;;  %v2230_v29 = vpop.f32.mrb[5].mxu1 }
 0x2d7   : > { %v675_v30 = vpop.f32.mrb[6].mxu1  ;;  %v723_v40 = vld [vmem:[#allocation3] sm:$0xf] }
 0x2d8   : > { %679 = vst.msk [vmem:[#allocation4] sm:$0xf] %vm635_vm2, %v678_v28  ;;  %v2231_v31 = vpop.f32.mrb[7].mxu1 }
 0x2dd   : > { %v715_v32 = vpop.f32.mrb[8].mxu1 }
 0x2de   : > { %v721_v33 = vpack.c.bf16 %v715_v32, %v715_v32  ;;  %v2236_v34 = vpop.f32.mrb[9].mxu1 }
 0x2df   : > { %v718_v35 = vpop.f32.mrb[10].mxu1  ;;  %v724_v36 = vld [vmem:[#allocation4] sm:$0xf] }
 0x2e0   : > { %722 = vst.msk [vmem:[#allocation5] sm:$0xf] %vm635_vm2, %v721_v33  ;;  %v2237_v37 = vpop.f32.mrb[11].mxu1  ;;  %v731_v38 = vsel %vm726_vm3, %v724_v36, 0 }
 0x2e1   : > { %2239 = vmatpush3.bf16.xpose.msra.mxu1 %v731_v38 }
 0x2e2   : > { %2250 = vmatprep.subr.bf16.mxu1 %v2809_v8 }
 0x2e7   : > { %v725_v41 = vld [vmem:[#allocation5] sm:$0xf] }
 0x2e8   : > { %2241 = vmatmul.mubr.msk.bf16.vlgmr.msra.gmra.mrb[12].mxu1 %vm726_vm3, %v723_v40  ;;  %v790_v42 = vsel %vm788_vm4, %v725_v41, 0 }
 0x2e9   : > { %2245 = vmatpush3.bf16.msra.mxu0 %v790_v42  ;;  %2251 = vmatpush3.bf16.xpose.msra.mxu1 %v835_v39 }
 0x2ea   : > { %2252 = vmatprep.mubr.msk.bf16.mxu1 %vm2810_vm1, %v2809_v8  ;;  %2262 = vmatprep.subr.bf16.mxu1 %v2809_v8 }
 0x2eb   : > { %2256 = vmatprep.subr.bf16.mxu0 %v2809_v8 }
 0x2f0   : > { %2253 = vmatmul.mubr.bf16.vlgmr.msra.gmra.mrb[16].mxu1 %v3178_v19 }
 0x2f1   : > { %2263 = vmatpush3.bf16.xpose.msra.mxu1 %v2105_v43  ;;  %2264 = vmatprep.mubr.msk.bf16.mxu1 %vm2810_vm1, %v2809_v8 }
 0x2f2   : > { %2274 = vmatprep.subr.bf16.mxu1 %v2809_v8 }
 0x2f8   : > { %2265 = vmatmul.mubr.bf16.vlgmr.msra.gmra.mrb[20].mxu1 %v3178_v19 }
 0x2f9   : > { %2276 = vmatprep.mubr.msk.bf16.mxu1 %vm2810_vm1, %v2809_v8 }
 0x3bb   : > { %v767_v44 = vpop.f32.mrb[12].mxu1 }
 0x3bc   : > { %v2242_v45 = vpop.f32.mrb[13].mxu1  ;;  %v773_v46 = vsel %vm726_vm3, %v767_v44, -inf }
 0x3bd   : > { %774 = vmax.xlane.f32.xlu1 %v773_v46  ;;  %v770_v47 = vpop.f32.mrb[14].mxu1 }
 0x3be   : > { %v2243_v48 = vpop.f32.mrb[15].mxu1 }
 0x3c3   : > { %v870_v49 = vpop.f32.mrb[16].mxu1 }
 0x3c4   : > { %v876_v50 = vpack.c.bf16 %v870_v49, %v870_v49  ;;  %v2254_v51 = vpop.f32.mrb[17].mxu1 }
 0x3c5   : > { %v873_v52 = vpop.f32.mrb[18].mxu1 }
 0x3c6   : > { %877 = vst.msk [vmem:[#allocation3] sm:$0xf] %vm635_vm2, %v876_v50  ;;  %v2255_v53 = vpop.f32.mrb[19].mxu1 }
 0x3c7   : > { %v1127_v53 = vld [vmem:[#allocation11 + $0x8] sm:$0xf] }
 0x3cb   : > { %v958_v54 = vpop.f32.mrb[20].mxu1 }
 0x3cc   : > { %v964_v55 = vpack.c.bf16 %v958_v54, %v958_v54  ;;  %v2266_v56 = vpop.f32.mrb[21].mxu1 }
 0x3cd   : > { %v961_v57 = vpop.f32.mrb[22].mxu1  ;;  %v966_v25 = vld [vmem:[#allocation3] sm:$0xf] }
 0x3ce   : > { %965 = vst.msk [vmem:[#allocation5] sm:$0xf] %vm635_vm2, %v964_v55  ;;  %v2267_v58 = vpop.f32.mrb[23].mxu1 }
 0x3d5   : > { %v968_v59 = vld [vmem:[#allocation5] sm:$0xf] }
 0x3d6   : > { %v1031_v60 = vsel %vm788_vm4, %v968_v59, 0 }
 0x3d7   : > { %2275 = vmatpush3.bf16.msra.mxu1 %v1031_v60 }
 0x3d8   : > { %2286 = vmatprep.subr.bf16.mxu1 %v2809_v8 }
 0x44a   : > { %v775_v61 = vpop.xlane.xlu1 %774 }
 0x44b   : > { %v776_v62 = vsub.f32 %v767_v44, %v775_v61 }
 0x44d   : > { %v777_v63 = vmul.f32 1.442695, %v776_v62 }
 0x44f   : > { %2531 = vpow2.f32 %v777_v63 }
 0x459   : > { %v2532_v1 = vpop.eup %2531 }
 0x45a   : > { %v779_v3 = vsel %vm726_vm3, %v2532_v1, 0.0 }
 0x45b   : > { %780 = vadd.xlane.f32.xlu1 %v779_v3  ;;  %v1331_v3 = vld [vmem:[#allocation9 + $0xc] sm:$0xf] }
 0x4e8   : > { %v781_v4 = vpop.xlane.xlu1 %780 }
 0x4e9   : > { %2533 = vrcp.f32 %v781_v4 }
 0x4f3   : > { %v2534_v5 = vpop.eup %2533 }
 0x4f4   : > { %v783_v6 = vmul.f32 %v2534_v5, %v2532_v1  ;;  %v2113_v5 = vld [vmem:[%s3406_s5 + $0xc] sm:$0xf] }
 0x4f6   : > { %v784_v7 = vpack.c.bf16 %v783_v6, %v783_v6 }
 0x4f8   : > { %2247 = vmatmul.mubr.msk.bf16.vlgmr.msra.gmra.mrb[0].mxu0 %vm726_vm3, %v784_v7 }
 0x4f9   : > { %2257 = vmatpush3.bf16.xpose.msra.mxu0 %v879_v9  ;;  %2258 = vmatprep.mubr.msk.bf16.mxu0 %vm2810_vm1, %v2809_v8 }
 0x4fa   : > { %2268 = vmatprep.subr.bf16.mxu0 %v2809_v8 }
 0x500   : > { %2259 = vmatmul.mubr.bf16.vlgmr.msra.gmra.mrb[4].mxu0 %v3178_v19 }
 0x501   : > { %2270 = vmatprep.mubr.msk.bf16.mxu0 %vm2810_vm1, %v2809_v8 }
 0x5cb   : > { %v826_v11 = vpop.f32.mrb[0].mxu0 }
 0x5cc   : > { %v832_v12 = vpack.c.bf16 %v826_v11, %v826_v11  ;;  %v2248_v13 = vpop.f32.mrb[1].mxu0 }
 0x5cd   : > { %v829_v14 = vpop.f32.mrb[2].mxu0 }
 0x5ce   : > { %v2249_v15 = vpop.f32.mrb[3].mxu0  ;;  %833 = vst.msk [vmem:[#allocation2] sm:$0xf] %vm635_vm2, %v832_v12 }
 0x5d3   : > { %v914_v16 = vpop.f32.mrb[4].mxu0 }
 0x5d4   : > { %v920_v17 = vpack.c.bf16 %v914_v16, %v914_v16  ;;  %v2260_v18 = vpop.f32.mrb[5].mxu0 }
 0x5d5   : > { %v917_v20 = vpop.f32.mrb[6].mxu0 }
 0x5d6   : > { %921 = vst.msk [vmem:[#allocation4] sm:$0xf] %vm635_vm2, %v920_v17  ;;  %v2261_v21 = vpop.f32.mrb[7].mxu0 }
 0x5dd   : > { %v967_v22 = vld [vmem:[#allocation4] sm:$0xf] }
 0x5de   : > { %v973_v23 = vsel %vm726_vm3, %v967_v22, 0 }
 0x5df   : > { %2269 = vmatpush3.bf16.xpose.msra.mxu0 %v973_v23 }
 0x5e0   : > { %2280 = vmatprep.subr.bf16.mxu0 %v2809_v8 }
 0x5e6   : > { %2271 = vmatmul.mubr.msk.bf16.vlgmr.msra.gmra.mrb[8].mxu0 %vm726_vm3, %v966_v25 }
 0x5e7   : > { %2281 = vmatpush3.bf16.xpose.msra.mxu0 %v1083_v24  ;;  %2282 = vmatprep.mubr.msk.bf16.mxu0 %vm2810_vm1, %v2809_v8 }
 0x5e8   : > { %2292 = vmatprep.subr.bf16.mxu0 %v2809_v8 }
 0x5ee   : > { %2283 = vmatmul.mubr.bf16.vlgmr.msra.gmra.mrb[12].mxu0 %v3178_v19 }
 0x5ef   : > { %2293 = vmatpush3.bf16.xpose.msra.mxu0 %v2109_v26  ;;  %2294 = vmatprep.mubr.msk.bf16.mxu0 %vm2810_vm1, %v2809_v8 }
 0x5f0   : > { %2304 = vmatprep.subr.bf16.mxu0 %v2809_v8 }
 0x5f6   : > { %2295 = vmatmul.mubr.bf16.vlgmr.msra.gmra.mrb[16].mxu0 %v3178_v19 }
 0x5f7   : > { %2306 = vmatprep.mubr.msk.bf16.mxu0 %vm2810_vm1, %v2809_v8 }
 0x6b9   : > { %v1009_v27 = vpop.f32.mrb[8].mxu0 }
 0x6ba   : > { %v2272_v28 = vpop.f32.mrb[9].mxu0  ;;  %v1015_v29 = vsel %vm726_vm3, %v1009_v27, -inf }
 0x6bb   : > { %1016 = vmax.xlane.f32.xlu0 %v1015_v29  ;;  %v1012_v30 = vpop.f32.mrb[10].mxu0 }
 0x6bc   : > { %v2273_v31 = vpop.f32.mrb[11].mxu0 }
 0x6c1   : > { %v1118_v32 = vpop.f32.mrb[12].mxu0 }
 0x6c2   : > { %v1124_v33 = vpack.c.bf16 %v1118_v32, %v1118_v32  ;;  %v2284_v34 = vpop.f32.mrb[13].mxu0 }
 0x6c3   : > { %v1121_v35 = vpop.f32.mrb[14].mxu0  ;;  %v1375_v34 = vld [vmem:[#allocation11 + $0xc] sm:$0xf] }
 0x6c4   : > { %1125 = vst.msk [vmem:[#allocation3] sm:$0xf] %vm635_vm2, %v1124_v33  ;;  %v2285_v36 = vpop.f32.mrb[15].mxu0 }
 0x6c9   : > { %v1206_v37 = vpop.f32.mrb[16].mxu0 }
 0x6ca   : > { %v1212_v38 = vpack.c.bf16 %v1206_v37, %v1206_v37  ;;  %v2296_v39 = vpop.f32.mrb[17].mxu0 }
 0x6cb   : > { %v1209_v40 = vpop.f32.mrb[18].mxu0  ;;  %v1214_v4 = vld [vmem:[#allocation3] sm:$0xf] }
 0x6cc   : > { %1213 = vst.msk [vmem:[#allocation5] sm:$0xf] %vm635_vm2, %v1212_v38  ;;  %v2297_v41 = vpop.f32.mrb[19].mxu0 }
 0x6d3   : > { %v1216_v42 = vld [vmem:[#allocation5] sm:$0xf] }
 0x6d4   : > { %v1279_v43 = vsel %vm788_vm4, %v1216_v42, 0 }
 0x6d5   : > { %2305 = vmatpush3.bf16.msra.mxu0 %v1279_v43 }
 0x6d6   : > { %2316 = vmatprep.subr.bf16.mxu0 %v2809_v8 }
 0x748   : > { %v1017_v44 = vpop.xlane.xlu0 %1016 }
 0x749   : > { %v1018_v45 = vsub.f32 %v1009_v27, %v1017_v44 }
 0x74b   : > { %v1019_v46 = vmul.f32 1.442695, %v1018_v45 }
 0x74d   : > { %2535 = vpow2.f32 %v1019_v46 }
 0x757   : > { %v2536_v47 = vpop.eup %2535 }
 0x758   : > { %v1021_v48 = vsel %vm726_vm3, %v2536_v47, 0.0 }
 0x759   : > { %1022 = vadd.xlane.f32.xlu1 %v1021_v48 }
 0x7e6   : > { %v1023_v49 = vpop.xlane.xlu1 %1022 }
 0x7e7   : > { %2537 = vrcp.f32 %v1023_v49 }
 0x7f1   : > { %v2538_v50 = vpop.eup %2537 }
 0x7f2   : > { %v1025_v51 = vmul.f32 %v2538_v50, %v2536_v47 }
 0x7f4   : > { %v1026_v52 = vpack.c.bf16 %v1025_v51, %v1025_v51 }
 0x7f6   : > { %2277 = vmatmul.mubr.msk.bf16.vlgmr.msra.gmra.mrb[24].mxu1 %vm726_vm3, %v1026_v52 }
 0x7f7   : > { %2287 = vmatpush3.bf16.xpose.msra.mxu1 %v1127_v53  ;;  %2288 = vmatprep.mubr.msk.bf16.mxu1 %vm2810_vm1, %v2809_v8 }
 0x7f8   : > { %2298 = vmatprep.subr.bf16.mxu1 %v2809_v8 }
 0x7fe   : > { %2289 = vmatmul.mubr.bf16.vlgmr.msra.gmra.mrb[28].mxu1 %v3178_v19 }
 0x7ff   : > { %2300 = vmatprep.mubr.msk.bf16.mxu1 %vm2810_vm1, %v2809_v8 }
 0x8c9   : > { %v3259_v54 = vpop.f32.mrb[24].mxu1 }
 0x8ca   : > { %v2278_v55 = vpop.f32.mrb[25].mxu1  ;;  %v2150_v51 = vpack.c.bf16 %v3259_v54, %v3259_v54 }
 0x8cb   : > { %v1070_v56 = vpop.f32.mrb[26].mxu1 }
 0x8cc   : > { %v2279_v57 = vpop.f32.mrb[27].mxu1 }
 0x8d1   : > { %v1162_v58 = vpop.f32.mrb[28].mxu1 }
 0x8d2   : > { %v1168_v59 = vpack.c.bf16 %v1162_v58, %v1162_v58  ;;  %v2290_v60 = vpop.f32.mrb[29].mxu1 }
 0x8d3   : > { %v1165_v61 = vpop.f32.mrb[30].mxu1 }
 0x8d4   : > { %1169 = vst.msk [vmem:[#allocation4] sm:$0xf] %vm635_vm2, %v1168_v59  ;;  %v2291_v62 = vpop.f32.mrb[31].mxu1 }
 0x8db   : > { %v1215_v63 = vld [vmem:[#allocation4] sm:$0xf] }
 0x8dc   : > { %v1221_v1 = vsel %vm726_vm3, %v1215_v63, 0 }
 0x8dd   : > { %2299 = vmatpush3.bf16.xpose.msra.mxu1 %v1221_v1  ;;  %v2505_v1 = vld [vmem:[#allocation12] sm:$0xff]  }
 0x8de   : > { %2310 = vmatprep.subr.bf16.mxu1 %v2809_v8 }
 0x8e4   : > { %2301 = vmatmul.mubr.msk.bf16.vlgmr.msra.gmra.mrb[32].mxu1 %vm726_vm3, %v1214_v4  ;;  %v2507_v4 = vld [vmem:[#allocation12 + $0x10] sm:$0xff]  }
 0x8e5   : > { %2311 = vmatpush3.bf16.xpose.msra.mxu1 %v1331_v3  ;;  %2312 = vmatprep.mubr.msk.bf16.mxu1 %vm2810_vm1, %v2809_v8  ;;  %v2506_v3 = vld [vmem:[#allocation12 + $0x8] sm:$0xff]  }
 0x8e6   : > { %2322 = vmatprep.subr.bf16.mxu1 %v2809_v8 }
 0x8ec   : > { %2313 = vmatmul.mubr.bf16.vlgmr.msra.gmra.mrb[36].mxu1 %v3178_v19 }
 0x8ed   : > { %2323 = vmatpush3.bf16.xpose.msra.mxu1 %v2113_v5  ;;  %2324 = vmatprep.mubr.msk.bf16.mxu1 %vm2810_vm1, %v2809_v8  ;;  %v2508_v5 = vld [vmem:[#allocation12 + $0x18] sm:$0xff]  }
 0x8ee   : > { %2334 = vmatprep.subr.bf16.mxu1 %v2809_v8 }
 0x8f4   : > { %2325 = vmatmul.mubr.bf16.vlgmr.msra.gmra.mrb[40].mxu1 %v3178_v19 }
 0x8f5   : > { %2336 = vmatprep.mubr.msk.bf16.mxu1 %vm2810_vm1, %v2809_v8 }
 0x9b7   : > { %v1257_v6 = vpop.f32.mrb[32].mxu1 }
 0x9b8   : > { %v2302_v7 = vpop.f32.mrb[33].mxu1  ;;  %v1263_v9 = vsel %vm726_vm3, %v1257_v6, -inf }
 0x9b9   : > { %1264 = vmax.xlane.f32.xlu0 %v1263_v9  ;;  %v1260_v10 = vpop.f32.mrb[34].mxu1  ;;  %v2510_v7 = vld [vmem:[#allocation12 + $0x28] sm:$0xff]   ;;  %v2511_v9 = vld [vmem:[#allocation12 + $0x30] sm:$0xff]  }
 0x9ba   : > { %v2303_v11 = vpop.f32.mrb[35].mxu1  ;;  %v2512_v10 = vld [vmem:[#allocation12 + $0x38] sm:$0xff]  }
 0x9bf   : > { %v1366_v12 = vpop.f32.mrb[36].mxu1 }
 0x9c0   : > { %v1372_v13 = vpack.c.bf16 %v1366_v12, %v1366_v12  ;;  %v2314_v14 = vpop.f32.mrb[37].mxu1 }
 0x9c1   : > { %v1369_v15 = vpop.f32.mrb[38].mxu1 }
 0x9c2   : > { %1373 = vst.msk [vmem:[#allocation3] sm:$0xf] %vm635_vm2, %v1372_v13  ;;  %v2315_v16 = vpop.f32.mrb[39].mxu1 }
 0x9c7   : > { %v1454_v17 = vpop.f32.mrb[40].mxu1 }
 0x9c8   : > { %v1460_v18 = vpack.c.bf16 %v1454_v17, %v1454_v17  ;;  %v2326_v20 = vpop.f32.mrb[41].mxu1 }
 0x9c9   : > { %v1457_v21 = vpop.f32.mrb[42].mxu1  ;;  %v2125_v20 = vld [vmem:[%s3443_s23] ss:$0 sm:$0xff]  ;;  %s3447_s23 = sld [smem:[#allocation28_spill]] }
 0x9ca   : > { %1461 = vst.msk [vmem:[#allocation5] sm:$0xf] %vm635_vm2, %v1460_v18  ;;  %v2327_v22 = vpop.f32.mrb[43].mxu1 }
 0x9d1   : > { %v1464_v23 = vld [vmem:[#allocation5] sm:$0xf] }
 0x9d2   : > { %v1527_v24 = vsel %vm788_vm4, %v1464_v23, 0 }
 0x9d3   : > { %2335 = vmatpush3.bf16.msra.mxu1 %v1527_v24 }
 0x9d4   : > { %2360 = vmatprep.subr.bf16.mxu1 %v2809_v8 }
 0xa46   : > { %v1265_v25 = vpop.xlane.xlu0 %1264 }
 0xa47   : > { %v1266_v26 = vsub.f32 %v1257_v6, %v1265_v25  ;;  %v2509_v6 = vld [vmem:[#allocation12 + $0x20] sm:$0xff]  }
 0xa49   : > { %v1267_v27 = vmul.f32 1.442695, %v1266_v26  ;;  %v2513_v26 = vld [vmem:[#allocation14] sm:$0xff]  }
 0xa4b   : > { %2539 = vpow2.f32 %v1267_v27  ;;  %v2514_v27 = vld [vmem:[#allocation14 + $0x8] sm:$0xff]  }
 0xa55   : > { %v2540_v28 = vpop.eup %2539 }
 0xa56   : > { %v1269_v29 = vsel %vm726_vm3, %v2540_v28, 0.0 }
 0xa57   : > { %1270 = vadd.xlane.f32.xlu1 %v1269_v29 }
 0xae4   : > { %v1271_v30 = vpop.xlane.xlu1 %1270 }
 0xae5   : > { %2541 = vrcp.f32 %v1271_v30 }
 0xaef   : > { %v2542_v31 = vpop.eup %2541 }
 0xaf0   : > { %v1273_v32 = vmul.f32 %v2542_v31, %v2540_v28 }
 0xaf2   : > { %v1274_v33 = vpack.c.bf16 %v1273_v32, %v1273_v32  ;;  %v2515_v32 = vld [vmem:[#allocation14 + $0x10] sm:$0xff]  }
 0xaf4   : > { %2307 = vmatmul.mubr.msk.bf16.vlgmr.msra.gmra.mrb[20].mxu0 %vm726_vm3, %v1274_v33  ;;  %v2516_v33 = vld [vmem:[#allocation14 + $0x18] sm:$0xff]  }
 0xaf5   : > { %2317 = vmatpush3.bf16.xpose.msra.mxu0 %v1375_v34  ;;  %2318 = vmatprep.mubr.msk.bf16.mxu0 %vm2810_vm1, %v2809_v8  ;;  %v2517_v34 = vld [vmem:[#allocation14 + $0x20] sm:$0xff]  }
 0xaf6   : > { %2328 = vmatprep.subr.bf16.mxu0 %v2809_v8 }
 0xafc   : > { %2319 = vmatmul.mubr.bf16.vlgmr.msra.gmra.mrb[24].mxu0 %v3178_v19  ;;  %v1462_v19 = vld [vmem:[#allocation3] sm:$0xf] }
 0xafd   : > { %2330 = vmatprep.mubr.msk.bf16.mxu0 %vm2810_vm1, %v2809_v8 }
 0xbc7   : > { %v1315_v35 = vpop.f32.mrb[20].mxu0 }
 0xbc8   : > { %v2308_v36 = vpop.f32.mrb[21].mxu0  ;;  %v2151_v59 = vpack.c.bf16 %v1315_v35, %v1315_v35  ;;  %v2518_v35 = vld [vmem:[#allocation14 + $0x28] sm:$0xff]  }
 0xbc9   : > { %v1318_v37 = vpop.f32.mrb[22].mxu0  ;;  %v2520_v36 = vld [vmem:[#allocation14 + $0x38] sm:$0xff]  }
 0xbca   : > { %v2309_v38 = vpop.f32.mrb[23].mxu0  ;;  %v2521_v37 = vld [vmem:[#allocation15] sm:$0xff]  }
 0xbcb   : > { %v2522_v38 = vld [vmem:[#allocation15 + $0x8] sm:$0xff]  }
 0xbcf   : > { %v1410_v39 = vpop.f32.mrb[24].mxu0 }
 0xbd0   : > { %v1416_v40 = vpack.c.bf16 %v1410_v39, %v1410_v39  ;;  %v2320_v41 = vpop.f32.mrb[25].mxu0  ;;  %v2523_v39 = vld [vmem:[#allocation15 + $0x10] sm:$0xff]  }
 0xbd1   : > { %v1413_v42 = vpop.f32.mrb[26].mxu0 }
 0xbd2   : > { %1417 = vst.msk [vmem:[#allocation4] sm:$0xf] %vm635_vm2, %v1416_v40  ;;  %v2321_v43 = vpop.f32.mrb[27].mxu0 }
 0xbd9   : > { %v1463_v44 = vld [vmem:[#allocation4] sm:$0xf] }
 0xbda   : > { %v1469_v45 = vsel %vm726_vm3, %v1463_v44, 0  ;;  %v2126_v44 = vld [vmem:[%s3444_s7] ss:$0 sm:$0xff]  ;;  %s1965_s7 = sshll.u32 %s555_s18, 4  ;;  %s3359_s7 = int_to_ptr.vmem [resolvable:$true] %s1965_s7 }
 0xbdb   : > { %2329 = vmatpush3.bf16.xpose.msra.mxu0 %v1469_v45  ;;  %s2721_s17 = scalar_lea.vmem %s3359_s7, 128 }
 0xbdc   : > { %2340 = vmatprep.subr.bf16.mxu0 %v2809_v8  ;;  %p2722_p7 = scmp.ne.s32.totalorder %s3359_s7, %s2721_s17 }
 0xbde   : > { %p2723_p12 = pnand %p2722_p7, %p3449_p4 }
 0xbe0   : > { %p2724_p1 = pneg %p2723_p12 }
 0xbe2   : > { %2331 = vmatmul.mubr.msk.bf16.vlgmr.msra.gmra.mrb[28].mxu0 %vm726_vm3, %v1462_v19  ;;  %v2127_v19 = vld [vmem:[%s3445_s14] ss:$0 sm:$0xff]  ;;  %s3448_s14 = sld [smem:[#allocation29_spill]] }
 0xbe3   : > { %2356 = vmatprep.mubr.msk.bf16.mxu0 %vm2810_vm1, %v2809_v8  ;;  %2341 = vmatpush3.bf16.msra.mxu0 %v2505_v1 }
 0xbe4   : > { %2342 = vmatprep.subr.bf16.mxu0 %v2809_v8 }
 0xbe7   : > { %2343 = vmatpush3.bf16.msra.mxu0 %v2506_v3  ;;  %v2137_v3 = vld [vmem:[%s3447_s23] ss:$0 sm:$0xff] }
 0xbe8   : > { %2344 = vmatprep.subr.bf16.mxu0 %v2809_v8 }
 0xbeb   : > { %2345 = vmatpush3.bf16.msra.mxu0 %v2507_v4 }
 0xbec   : > { %2346 = vmatprep.subr.bf16.mxu0 %v2809_v8 }
 0xbef   : > { %2347 = vmatpush3.bf16.msra.mxu0 %v2508_v5 }
 0xbf0   : > { %2348 = vmatprep.subr.bf16.mxu0 %v2809_v8 }
 0xbf3   : > { %2349 = vmatpush3.bf16.msra.mxu0 %v2509_v6 }
 0xbf4   : > { %2350 = vmatprep.subr.bf16.mxu0 %v2809_v8 }
 0xbf7   : > { %2351 = vmatpush3.bf16.msra.mxu0 %v2510_v7 }
 0xbf8   : > { %2352 = vmatprep.subr.bf16.mxu0 %v2809_v8 }
 0xbfb   : > { %2353 = vmatpush3.bf16.msra.mxu0 %v2511_v9 }
 0xbfc   : > { %2354 = vmatprep.subr.bf16.mxu0 %v2809_v8 }
 0xbff   : > { %2355 = vmatpush3.bf16.msra.mxu0 %v2512_v10 }
 0xc00   : > { %2380 = vmatprep.subr.bf16.mxu0 %v2809_v8 }
 0xcb5   : > { %v1505_v46 = vpop.f32.mrb[28].mxu0 }
 0xcb6   : > { %v2332_v47 = vpop.f32.mrb[29].mxu0  ;;  %v1511_v48 = vsel %vm726_vm3, %v1505_v46, -inf }
 0xcb7   : > { %1512 = vmax.xlane.f32.xlu0 %v1511_v48  ;;  %v1508_v49 = vpop.f32.mrb[30].mxu0 }
 0xcb8   : > { %v2333_v50 = vpop.f32.mrb[31].mxu0  ;;  %v2524_v49 = vld [vmem:[#allocation15 + $0x18] sm:$0xff]  }
 0xcb9   : > { %v2525_v50 = vld [vmem:[#allocation15 + $0x20] sm:$0xff]  }
 0xccd   : > { %1077 = vrot.lane.b32.xlu0 %v2150_v51, %s2812_s20  ;;  %v2526_v51 = vld [vmem:[#allocation15 + $0x28] sm:$0xff]   ;;  %s3357_s20 = scalar_lea.hbm %s3448_s14, %s2147_s13 }
 0xd44   : > { %v1513_v52 = vpop.xlane.xlu0 %1512 }
 0xd45   : > { %v1514_v53 = vsub.f32 %v1505_v46, %v1513_v52  ;;  %v2527_v52 = vld [vmem:[#allocation15 + $0x30] sm:$0xff]  }
 0xd47   : > { %v1515_v55 = vmul.f32 1.442695, %v1514_v53  ;;  %v2528_v53 = vld [vmem:[#allocation15 + $0x38] sm:$0xff]  }
 0xd48   : > { %v1078_v56 = vpop.permute.xlu0 %1077 }
 0xd49   : > { %2543 = vpow2.f32 %v1515_v55  ;;  %1081 = vst.msk [vmem:[#allocation2] sm:$0xf] %vm1080_vm5, %v1078_v56 }
 0xd53   : > { %v2544_v57 = vpop.eup %2543 }
 0xd54   : > { %v1517_v58 = vsel %vm726_vm3, %v2544_v57, 0.0 }
 0xd55   : > { %1518 = vadd.xlane.f32.xlu1 %v1517_v58 }
 0xd66   : > { %1325 = vrot.lane.b32.xlu1 %v2151_v59, %s2813_s11  ;;  %s2815_s11 = smov [#allocation17]  }
 0xde2   : > { %v1519_v60 = vpop.xlane.xlu1 %1518 }
 0xde3   : > { %2545 = vrcp.f32 %v1519_v60 }
 0xde6   : > { %v1326_v54 = vpop.permute.xlu1 %1325 }
 0xde7   : > { %1329 = vst.msk [vmem:[#allocation2] sm:$0xf] %vm1328_vm6, %v1326_v54 }
 0xded   : > { %v2546_v61 = vpop.eup %2545 }
 0xdee   : > { %v1521_v62 = vmul.f32 %v2546_v61, %v2544_v57 }
 0xdf0   : > { %v1522_v63 = vpack.c.bf16 %v1521_v62, %v1521_v62 }
 0xdf2   : > { %2337 = vmatmul.mubr.msk.bf16.vlgmr.msra.gmra.mrb[44].mxu1 %vm726_vm3, %v1522_v63 }
 0xdf3   : > { %2376 = vmatprep.mubr.msk.bf16.mxu1 %vm2810_vm1, %v2809_v8  ;;  %2361 = vmatpush3.bf16.msra.mxu1 %v2513_v26 }
 0xdf4   : > { %2362 = vmatprep.subr.bf16.mxu1 %v2809_v8 }
 0xdf7   : > { %2363 = vmatpush3.bf16.msra.mxu1 %v2514_v27 }
 0xdf8   : > { %2364 = vmatprep.subr.bf16.mxu1 %v2809_v8 }
 0xdfb   : > { %2365 = vmatpush3.bf16.msra.mxu1 %v2515_v32 }
 0xdfc   : > { %2366 = vmatprep.subr.bf16.mxu1 %v2809_v8 }
 0xdff   : > { %2367 = vmatpush3.bf16.msra.mxu1 %v2516_v33 }
 0xe00   : > { %2368 = vmatprep.subr.bf16.mxu1 %v2809_v8 }
 0xe03   : > { %2369 = vmatpush3.bf16.msra.mxu1 %v2517_v34 }
 0xe04   : > { %2370 = vmatprep.subr.bf16.mxu1 %v2809_v8 }
 0xe07   : > { %2371 = vmatpush3.bf16.msra.mxu1 %v2518_v35 }
 0xe08   : > { %2372 = vmatprep.subr.bf16.mxu1 %v2809_v8 }
 0xe0b   : > { %2373 = vmatpush3.bf16.msra.mxu1 %v2519_v2 }
 0xe0c   : > { %2374 = vmatprep.subr.bf16.mxu1 %v2809_v8 }
 0xe0f   : > { %2375 = vmatpush3.bf16.msra.mxu1 %v2520_v36 }
 0xec5   : > { %v1563_v11 = vpop.f32.mrb[44].mxu1 }
 0xec6   : > { %v2152_v12 = vpack.c.bf16 %v1563_v11, %v1563_v11  ;;  %v2338_v13 = vpop.f32.mrb[45].mxu1 }
 0xec7   : > { %v1566_v14 = vpop.f32.mrb[46].mxu1 }
 0xec8   : > { %1573 = vrot.lane.b32.xlu1 %v2152_v12, %s2814_s22  ;;  %v2339_v15 = vpop.f32.mrb[47].mxu1  ;;  %s3446_s22 = sld [smem:[#allocation27_spill]] }
 0xece   : > { %v2128_v55 = vld [vmem:[%s3446_s22] ss:$0 sm:$0xff]  ;;  %s2725_s22 = sshll.u32 %s2815_s11, 4  ;;  %s2726_s22 = int_to_ptr.vmem [resolvable:$false] %s2725_s22 }
 0xecf   : > { %s2727_s9 = scalar_lea.vmem %s2726_s22, 256  ;;  %p2728_p13 = scmp.lt.s32.totalorder %s3359_s7, %s2726_s22 }
 0xed0   : > { %p2729_p0 = scmp.lt.s32.totalorder %s2727_s9, %s2721_s17 }
 0xed2   : > { %p2730_p2 = por %p2729_p0, %p2728_p13 }
 0xed4   : > { %p2731_p3 = pnand %p2730_p2, %p2724_p1 }
 0xf3a   : > { %v1574_v16 = vpop.permute.xlu1 %1573 }
 0xf3b   : > { %1577 = vst.msk [vmem:[#allocation2] sm:$0xf] %vm1576_vm7, %v1574_v16 }
 0xf42   : > { %v1578_v17 = vld [vmem:[#allocation2] sm:$0xf] }
 0xf43   : > { %2357 = vmatmul.mubr.bf16.vlgmr.msra.gmra.mrb[32].mxu0 %v1578_v17 }
 0xf44   : > { %2396 = vmatprep.mubr.msk.bf16.mxu0 %vm2810_vm1, %v2809_v8  ;;  %2381 = vmatpush3.bf16.msra.mxu0 %v2521_v37 }
 0xf45   : > { %2382 = vmatprep.subr.bf16.mxu0 %v2809_v8 }
 0xf48   : > { %2383 = vmatpush3.bf16.msra.mxu0 %v2522_v38 }
 0xf49   : > { %2384 = vmatprep.subr.bf16.mxu0 %v2809_v8 }
 0xf4c   : > { %2385 = vmatpush3.bf16.msra.mxu0 %v2523_v39 }
 0xf4d   : > { %2386 = vmatprep.subr.bf16.mxu0 %v2809_v8 }
 0xf50   : > { %2387 = vmatpush3.bf16.msra.mxu0 %v2524_v49 }
 0xf51   : > { %2388 = vmatprep.subr.bf16.mxu0 %v2809_v8 }
 0xf54   : > { %2389 = vmatpush3.bf16.msra.mxu0 %v2525_v50 }
 0xf55   : > { %2390 = vmatprep.subr.bf16.mxu0 %v2809_v8 }
 0xf58   : > { %2391 = vmatpush3.bf16.msra.mxu0 %v2526_v51 }
 0xf59   : > { %2392 = vmatprep.subr.bf16.mxu0 %v2809_v8 }
 0xf5c   : > { %2393 = vmatpush3.bf16.msra.mxu0 %v2527_v52 }
 0xf5d   : > { %2394 = vmatprep.subr.bf16.mxu0 %v2809_v8 }
 0xf60   : > { %2395 = vmatpush3.bf16.msra.mxu0 %v2528_v53 }
0x1016   : > { %v1677_v18 = vpop.f32.mrb[32].mxu0 }
0x1017   : > { %v1683_v21 = vadd.f32 %v1677_v18, %v3156_v0  ;;  %v2358_v22 = vpop.f32.mrb[33].mxu0 }
0x1018   : > { %v1680_v23 = vpop.f32.mrb[34].mxu0 }
0x1019   : > { %v3318_v24 = vadd.f32 %v2125_v20, %v1683_v21  ;;  %v2359_v25 = vpop.f32.mrb[35].mxu0 }
0x101b   : > { %1694 = vadd.xlane.f32.xlu1 %v3318_v24 }
0x10a8   : > { %v1695_v28 = vpop.xlane.xlu1 %1694 }
0x10a9   : > { %v1696_v29 = vmul.f32 0.03125, %v1695_v28 }
0x10ab   : > { %v1697_v30 = vsub.f32 %v3318_v24, %v1696_v29 }
0x10ad   : > { %v1698_v0 = vsel %vm566_vm0, %v1697_v30, 0.0 }
0x10ae   : > { %v1699_v31 = vmul.f32 %v1698_v0, %v1698_v0 }
0x10b0   : > { %1700 = vadd.xlane.f32.xlu0 %v1699_v31 }
0x113d   : > { %v1701_v40 = vpop.xlane.xlu0 %1700 }
0x113e   : > { %v1702_v41 = vmul.f32 0.03125, %v1701_v40 }
0x1140   : > { %v1703_v42 = vadd.f32 1e-05, %v1702_v41 }
0x1142   : > { %2547 = vrsqrt.f32 %v1703_v42 }
0x114c   : > { %v2548_v43 = vpop.eup %2547 }
0x114d   : > { %v1705_v45 = vmul.f32 %v2548_v43, %v1698_v0 }
0x114f   : > { %v1712_v46 = vmul.f32 %v2126_v44, %v1705_v45 }
0x1151   : > { %v1719_v47 = vadd.f32 %v2127_v19, %v1712_v46 }
0x1153   : > { %v1720_v48 = vpack.c.bf16 %v1719_v47, %v1719_v47 }
0x1155   : > { %2377 = vmatmul.mubr.bf16.vlgmr.msra.gmra.mrb[48].mxu1 %v1720_v48 }
0x1228   : > { %v1826_v56 = vpop.f32.mrb[48].mxu1 }
0x1229   : > { %v1827_v57 = vadd.f32 %v2128_v55, %v1826_v56  ;;  %v2378_v58 = vpop.f32.mrb[49].mxu1 }
0x122a   : > { %v1829_v59 = vpop.f32.mrb[50].mxu1 }
0x122b   : > { %v1833_v60 = vmul.f32 0.70710677, %v1827_v57  ;;  %v2379_v54 = vpop.f32.mrb[51].mxu1  ;;  %v1832_v62 = vmul.f32 0.5, %v1827_v57 }
0x122d   : > { %2549 = verf.f32 %v1833_v60 }
0x1237   : > { %v2550_v61 = vpop.eup %2549 }
0x1238   : > { %v1835_v63 = vadd.f32 1.0, %v2550_v61 }
0x123a   : > { %v1836_v1 = vmul.f32 %v1835_v63, %v1832_v62 }
0x123c   : > { %v1837_v8 = vpack.c.bf16 %v1836_v1, %v1836_v1 }
0x123e   : > { %2397 = vmatmul.mubr.bf16.vlgmr.msra.gmra.mrb[36].mxu0 %v1837_v8 }
0x1311   : > { %v1943_v4 = vpop.f32.mrb[36].mxu0 }
0x1312   : > { %v1944_v5 = vadd.f32 %v2137_v3, %v1943_v4  ;;  %v2398_v6 = vpop.f32.mrb[37].mxu0 }
0x1313   : > { %v1946_v7 = vpop.f32.mrb[38].mxu0 }
0x1314   : > { %v1949_v9 = vadd.f32 %v1944_v5, %v3318_v24  ;;  %v2399_v10 = vpop.f32.mrb[39].mxu0 }
0x1316   : > { %1950 = vst [vmem:[%s555_s18] sm:$0xff] %v1949_v9 }
0x1317   : > { %2734 = shalt.err (!%p2731_p3)
}
0x1318   : > { %s2735_s3 = scalar_lea.hbm %s3357_s20, 128  ;;  %s2739_s13 = scalar_lea.hbm %s3448_s14, 256 }
0x1319   : > { %p2736_p6 = scmp.ne.s32.totalorder %s3357_s20, %s2735_s3  ;;  %p2740_p8 = scmp.lt.u32.totalorder %s3357_s20, %s3448_s14 }
0x131a   : > { %p2741_p5 = scmp.lt.u32.totalorder %s2739_s13, %s2735_s3  ;;  %p2743_p7 = scmp.lt.u32.totalorder %s2735_s3, %s3357_s20 }
0x131b   : > { %p2737_p10 = pnand %p2736_p6, %p3449_p4 }
0x131c   : > { %p2742_p9 = por %p2741_p5, %p2740_p8 }
0x131d   : > { %p2738_p11 = pneg %p2737_p10 }
0x131e   : > { %p2744_p12 = por %p2743_p7, %p2742_p9 }
0x1320   : > { %p2745_p1 = pnand %p2744_p12, %p2738_p11 }
0x1322   : > { %2748 = shalt.err (!%p2745_p1)
}
0x1323   : > { %2422 = dma.vmem_to_hbm [thread:$0]  (%p3449_p4), %s3359_s7, 128, %s3357_s20, %s1952_s19  }
0x1324 PF: > { %s1977_s24 = sand.u32 1, %s2787_s29   ;;  %p3450_p13 = scmp.ne.s32.totalorder %s3434_s27, 0 }
0x1325   : > { %p3451_p0 = scmp.ge.s32.totalorder %s2799_s16, 2  ;;  %s1978_s17 = scalar_lea.sflag [#allocation8], %s1977_s24 }
0x1327   : > { %p2445_p2 = pnand %p3451_p0, %p3450_p13 }
0x1329   : > { %2782 = dma.done.wait (!%p2445_p2), %s1978_s17, 128  }
0x132a   : > { %2784 = vsyncadd (!%p2445_p2), %s1978_s17, 4294967168  ;;  %p30_p3 = scmp.ge.s32.totalorder %s3064_s21, 4   ;;  %s3452_s29 = smov %s2791_s30 }
0x132b   : > { %s3453_s30 = smov %s2795_s15  ;;  %s3454_s15 = smov %s3076_s8 }
0x132c   : > { %s3455_s16 = smov %s3064_s21  ;;  %32 = sbr.rel (!%p30_p3) target bundleno = 16 (0x10), region = 150 }
0x1333   :  { %1983 = vsyncpa [#allocation7], 1 }
0x1334   :  { %1985 = vsyncpa [#allocation7 + $0x1], 1 }
0x1335   :  { %1986 = vsyncpa [#allocation10], 1 }
0x1336   :  { %1987 = vsyncpa [#allocation13], 1 }
0x1337   :  { %1988 = vsyncpa [#allocation16], 1 }
0x1338   :  { %1989 = vsyncpa [#allocation8], 1 }
0x1339   :  { %1991 = vsyncpa [#allocation8 + $0x1], 1 }

</bundles_post_ra>
